<compile_context>
chip_gen: v7x
topology: tpu7x:2x2x1
jax: 0.10.0
libtpu: 0.0.40
codegen_flags: <defaults>
</compile_context>

<pallas_src>
import functools
import math

import jax
import jax.numpy as jnp
from jax import lax
from jax.experimental import pallas as pl
from jax.experimental.pallas import tpu as pltpu

HEAD_SIZE = 64          # the "64" hard-coded in RUN_CUDA_RWKV7g
CHUNK_LEN = 16          # T must be a multiple of this (matches the CUDA assert)


# ----------------------------------------------------------------------------
# helpers
# ----------------------------------------------------------------------------
def _pick_tile(dim, target, base):
    """Largest multiple-of-`base` divisor of `dim` that is <= target, else dim."""
    if dim <= target:
        return dim
    t = (target // base) * base
    while t >= base:
        if dim % t == 0:
            return t
        t -= base
    return dim


def _softplus(x):
    return jnp.maximum(x, 0.0) + jnp.log(1.0 + jnp.exp(-jnp.abs(x)))


def _apply_act(z, act):
    if act == 'none':
        return z
    if act == 'tanh':
        return jnp.tanh(z)
    if act == 'sigmoid':
        return jax.nn.sigmoid(z)
    if act == 'relu_sq':
        z = jnp.maximum(z, 0.0)
        return z * z
    if act == 'logdecay':
        # log of the WKV decay:  log(exp(-exp(w))) = -exp(w),
        # with w = -softplus(-(w0 + lora)) - 0.5
        return -jnp.exp(-_softplus(-z) - 0.5)
    raise ValueError(act)


def _bf16(w):
    return w if w.dtype == jnp.bfloat16 else w.astype(jnp.bfloat16)


# ----------------------------------------------------------------------------
# Tiled matmul (full-K stripes) with fused prologue / epilogue
# ----------------------------------------------------------------------------
def _make_mm_kernel(has_mix, has_mult, has_bias, act):
    def kern(*refs):
        i = 0
        x_ref = refs[i]; i += 1
        xp_ref = mix_ref = m_ref = b_ref = None
        if has_mix:
            xp_ref, mix_ref = refs[i], refs[i + 1]; i += 2
        if has_mult:
            m_ref = refs[i]; i += 1
        w_ref = refs[i]; i += 1
        if has_bias:
            b_ref = refs[i]; i += 1
        o_ref = refs[i]

        x = x_ref[...]
        if has_mix or has_mult:
            x = x.astype(jnp.float32)
            if has_mix:
                x = x + (xp_ref[...].astype(jnp.float32) - x) * mix_ref[...]
            if has_mult:
                x = x * m_ref[...].astype(jnp.float32)
        z = jnp.dot(x.astype(jnp.bfloat16), w_ref[...],
                    preferred_element_type=jnp.float32)
        if has_bias:
            z = z + b_ref[...]
        o_ref[...] = _apply_act(z, act).astype(o_ref.dtype)
    return kern


def _mm_tiles(M, K, N, has_mix, has_mult):
    tm = _pick_tile(M, 256, 16)
    budget = 40 * 1024 * 1024
    tn = _pick_tile(N, 512, 128)
    for tgt in (512, 256, 128):
        tn = _pick_tile(N, tgt, 128)
        lhs = tm * K * 2 * (2 if has_mix else 1) + (tm * K * 2 if has_mult else 0)
        rhs = K * tn * 2
        out = tm * tn * 4
        if 2 * (lhs + rhs + out) <= budget:
            break
    return tm, tn


def pallas_matmul(x, w, *, xprev=None, mix=None, mult=None, bias=None,
                  act='none', out_dtype=jnp.float32):
    """out = act(prologue(x) @ w + bias); bf16 MXU operands, fp32 accumulation."""
    M, K = x.shape
    K2, N = w.shape
    assert K == K2
    has_mix, has_mult, has_bias = mix is not None, mult is not None, bias is not None
    assert (not has_mix) or (xprev is not None)
    tm, tn = _mm_tiles(M, K, N, has_mix, has_mult)

    x_spec = pl.BlockSpec((tm, K), lambda i, j: (i, 0))   # j-invariant -> fetched once per i
    in_specs, operands = [x_spec], [x]
    if has_mix:
        in_specs += [x_spec, pl.BlockSpec((1, K), lambda i, j: (0, 0))]
        operands += [xprev, mix.reshape(1, K)]
    if has_mult:
        in_specs.append(x_spec)
        operands.append(mult)
    in_specs.append(pl.BlockSpec((K, tn), lambda i, j: (0, j)))
    operands.append(_bf16(w))
    if has_bias:
        in_specs.append(pl.BlockSpec((1, tn), lambda i, j: (0, j)))
        operands.append(bias.reshape(1, N))

    return pl.pallas_call(
        _make_mm_kernel(has_mix, has_mult, has_bias, act),
        out_shape=jax.ShapeDtypeStruct((M, N), out_dtype),
        grid=(M // tm, N // tn),
        in_specs=in_specs,
        out_specs=pl.BlockSpec((tm, tn), lambda i, j: (i, j)),
        compiler_params=pltpu.CompilerParams(
            dimension_semantics=("parallel", "arbitrary"),
            vmem_limit_bytes=48 * 1024 * 1024),
    )(*operands)


# ----------------------------------------------------------------------------
# Fused two-stage LoRA: act2(act1((mix(x)) @ w1) @ w2 + bias)
# ----------------------------------------------------------------------------
def _make_lora_kernel(has_mix, has_bias, act1, act2):
    def kern(*refs):
        i = 0
        x_ref = refs[i]; i += 1
        xp_ref = mix_ref = b_ref = None
        if has_mix:
            xp_ref, mix_ref = refs[i], refs[i + 1]; i += 2
        w1_ref = refs[i]; i += 1
        w2_ref = refs[i]; i += 1
        if has_bias:
            b_ref = refs[i]; i += 1
        o_ref = refs[i]

        x = x_ref[...].astype(jnp.float32)
        if has_mix:
            x = x + (xp_ref[...].astype(jnp.float32) - x) * mix_ref[...]
        h = jnp.dot(x.astype(jnp.bfloat16), w1_ref[...],
                    preferred_element_type=jnp.float32)
        h = _apply_act(h, act1)
        z = jnp.dot(h.astype(jnp.bfloat16), w2_ref[...],
                    preferred_element_type=jnp.float32)
        if has_bias:
            z = z + b_ref[...]
        o_ref[...] = _apply_act(z, act2).astype(o_ref.dtype)
    return kern


def pallas_lora(x, w1, w2, *, xprev=None, mix=None, bias=None,
                act1='none', act2='none', out_dtype=jnp.float32):
    M, K = x.shape
    K1, D = w1.shape
    D2, N = w2.shape
    assert K == K1 and D == D2
    has_mix, has_bias = mix is not None, bias is not None
    tm = _pick_tile(M, 256, 16)

    x_spec = pl.BlockSpec((tm, K), lambda i: (i, 0))
    in_specs, operands = [x_spec], [x]
    if has_mix:
        in_specs += [x_spec, pl.BlockSpec((1, K), lambda i: (0, 0))]
        operands += [xprev, mix.reshape(1, K)]
    in_specs += [pl.BlockSpec((K, D), lambda i: (0, 0)),
                 pl.BlockSpec((D, N), lambda i: (0, 0))]
    operands += [_bf16(w1), _bf16(w2)]
    if has_bias:
        in_specs.append(pl.BlockSpec((1, N), lambda i: (0, 0)))
        operands.append(bias.reshape(1, N))

    return pl.pallas_call(
        _make_lora_kernel(has_mix, has_bias, act1, act2),
        out_shape=jax.ShapeDtypeStruct((M, N), out_dtype),
        grid=(M // tm,),
        in_specs=in_specs,
        out_specs=pl.BlockSpec((tm, N), lambda i: (i, 0)),
        compiler_params=pltpu.CompilerParams(
            dimension_semantics=("parallel",),
            vmem_limit_bytes=48 * 1024 * 1024),
    )(*operands)


# ----------------------------------------------------------------------------
# Row-tiled LayerNorm
# ----------------------------------------------------------------------------
def _layernorm_kernel(x_ref, g_ref, b_ref, o_ref, *, eps):
    x = x_ref[...]
    mean = jnp.mean(x, axis=-1, keepdims=True)
    xc = x - mean
    var = jnp.mean(xc * xc, axis=-1, keepdims=True)
    o_ref[...] = (xc * lax.rsqrt(var + eps) * g_ref[...]
                  + b_ref[...]).astype(o_ref.dtype)


def pallas_layernorm(x2d, gamma, beta, eps=1e-5, out_dtype=jnp.float32):
    M, C = x2d.shape
    tm = _pick_tile(M, 256, 16)
    return pl.pallas_call(
        functools.partial(_layernorm_kernel, eps=eps),
        out_shape=jax.ShapeDtypeStruct((M, C), out_dtype),
        grid=(M // tm,),
        in_specs=[pl.BlockSpec((tm, C), lambda i: (i, 0)),
                  pl.BlockSpec((1, C), lambda i: (0, 0)),
                  pl.BlockSpec((1, C), lambda i: (0, 0))],
        out_specs=pl.BlockSpec((tm, C), lambda i: (i, 0)),
        compiler_params=pltpu.CompilerParams(
            dimension_semantics=("parallel",),
            vmem_limit_bytes=32 * 1024 * 1024),
    )(x2d, gamma.reshape(1, C), beta.reshape(1, C))


# ----------------------------------------------------------------------------
# Fused GroupNorm (centered) + r_k "bonus" term (skinny segment indicators)
# ----------------------------------------------------------------------------
def _gn_bonus_kernel(y_ref, r_ref, k_ref, v_ref, rk_ref, g_ref, b_ref, o_ref, *,
                     eps, num_groups):
    tm, C = y_ref.shape
    H = num_groups
    N = C // H
    f32 = jnp.float32
    # skinny 0/1 segment-sum (C, H) and broadcast-back (H, C) indicators,
    # built in-kernel (O(C*H) MXU work instead of the old O(C^2) indicator).
    seg = (lax.broadcasted_iota(jnp.int32, (C, H), 0) // N ==
           lax.broadcasted_iota(jnp.int32, (C, H), 1)).astype(f32)
    segT = (lax.broadcasted_iota(jnp.int32, (H, C), 0) ==
            lax.broadcasted_iota(jnp.int32, (H, C), 1) // N).astype(f32)
    inv_n = 1.0 / N

    y = y_ref[...]
    mean = jnp.dot(jnp.dot(y, seg, preferred_element_type=f32) * inv_n, segT,
                   preferred_element_type=f32)
    yc = y - mean
    var = jnp.dot(jnp.dot(yc * yc, seg, preferred_element_type=f32) * inv_n, segT,
                  preferred_element_type=f32)
    yn = yc * lax.rsqrt(var + eps) * g_ref[...] + b_ref[...]
    # bonus = ((r*k*r_k).sum over head, keepdim) * v
    rk = r_ref[...] * k_ref[...] * rk_ref[...]
    bonus = jnp.dot(jnp.dot(rk, seg, preferred_element_type=f32), segT,
                    preferred_element_type=f32) * v_ref[...]
    o_ref[...] = (yn + bonus).astype(o_ref.dtype)


def pallas_gn_bonus(y, r, k, v, r_k, gamma, beta, eps, num_groups,
                    out_dtype=jnp.float32):
    M, C = y.shape
    tm = _pick_tile(M, 128, 16)
    vspec = pl.BlockSpec((tm, C), lambda i: (i, 0))
    pspec = pl.BlockSpec((1, C), lambda i: (0, 0))
    return pl.pallas_call(
        functools.partial(_gn_bonus_kernel, eps=eps, num_groups=num_groups),
        out_shape=jax.ShapeDtypeStruct((M, C), out_dtype),
        grid=(M // tm,),
        in_specs=[vspec, vspec, vspec, vspec, pspec, pspec, pspec],
        out_specs=vspec,
        compiler_params=pltpu.CompilerParams(
            dimension_semantics=("parallel",),
            vmem_limit_bytes=48 * 1024 * 1024),
    )(y, r, k, v, r_k.reshape(1, C), gamma.reshape(1, C), beta.reshape(1, C))


# ----------------------------------------------------------------------------
# WKV-7 recurrence, chunked (CHUNK_LEN) wind_backstepping-style formulation
# ----------------------------------------------------------------------------
def _wkv7_chunk_kernel(lw_ref, q_ref, k_ref, v_ref, a_ref, b_ref, y_ref,
                       state_ref, *, hp):
    """One (batch, head-group, time-chunk) step; `hp` heads packed along lanes.

    Per head h (lanes h*N .. h*N+N-1), with w_dec = exp(lw) the decay:
        sa_t = S_{t-1} a_t
        S_t  = S_{t-1} diag(w_t) + v_t k_t^T + sa_t b_t^T
        y_t  = S_t q_t
    rewritten over a chunk of L timesteps via cumulative log-decays, a strictly
    lower-triangular nilpotent solve for sa, and a single end-of-chunk state
    update - so the serial dependence chain is L times shorter than per-step.
    """
    L, W = lw_ref.shape
    N = W // hp
    f32 = jnp.float32

    @pl.when(pl.program_id(2) == 0)
    def _init():
        state_ref[...] = jnp.zeros_like(state_ref)

    row = lax.broadcasted_iota(jnp.int32, (L, L), 0)
    col = lax.broadcasted_iota(jnp.int32, (L, L), 1)
    tril_incl = (col <= row).astype(f32)
    tril_strict = (col < row).astype(f32)
    eye = (col == row).astype(f32)

    lw = lw_ref[...]                                           # (L, W) log-decay
    cls_incl = jnp.dot(tril_incl, lw, preferred_element_type=f32)   # cumsum incl t
    cls_excl = cls_incl - lw                                         # cumsum excl t
    cw_last = jnp.exp(cls_incl[L - 1:L, :])                          # (1, W)

    q_hat = q_ref[...] * jnp.exp(cls_incl)
    a_til = a_ref[...] * jnp.exp(cls_excl)
    dec_inv = jnp.exp(-cls_incl)
    k_til = k_ref[...] * dec_inv
    b_til = b_ref[...] * dec_inv
    v = v_ref[...]
    S = state_ref[...]                                         # (N, W): rows=value, cols=key

    y_parts, s_parts = [], []
    for h in range(hp):                                        # static, hp <= 4
        sl = slice(h * N, (h + 1) * N)
        a_h, q_h = a_til[:, sl], q_hat[:, sl]
        k_h, b_h = k_til[:, sl], b_til[:, sl]
        v_h, S_h = v[:, sl], S[:, sl]

        # sa0[t, i] = sum_j a~_t[j] S0[i, j] ; y0[t, i] = sum_j q^_t[j] S0[i, j]
        sa0 = lax.dot_general(a_h, S_h, (((1,), (1,)), ((), ())),
                              preferred_element_type=f32)      # (L, N)
        y0 = lax.dot_general(q_h, S_h, (((1,), (1,)), ((), ())),
                             preferred_element_type=f32)       # (L, N)
        Ak = lax.dot_general(a_h, k_h, (((1,), (1,)), ((), ())),
                             preferred_element_type=f32) * tril_strict   # (L, L)
        Ab = lax.dot_general(a_h, b_h, (((1,), (1,)), ((), ())),
                             preferred_element_type=f32) * tril_strict
        Qk = lax.dot_general(q_h, k_h, (((1,), (1,)), ((), ())),
                             preferred_element_type=f32) * tril_incl
        Qb = lax.dot_general(q_h, b_h, (((1,), (1,)), ((), ())),
                             preferred_element_type=f32) * tril_incl

        # (I - Ab)^(-1) = (I+Ab)(I+Ab^2)(I+Ab^4)(I+Ab^8): Ab strictly lower, nilpotent
        inv = eye + Ab
        m = Ab
        for _ in range(3):
            m = jnp.dot(m, m, preferred_element_type=f32)
            inv = inv + jnp.dot(inv, m, preferred_element_type=f32)

        rhs = sa0 + jnp.dot(Ak, v_h, preferred_element_type=f32)       # (L, N)
        SA = jnp.dot(inv, rhs, preferred_element_type=f32)             # sa rows
        y_h = (y0 + jnp.dot(Qk, v_h, preferred_element_type=f32)
               + jnp.dot(Qb, SA, preferred_element_type=f32))          # (L, N)
        y_parts.append(y_h)

        # end-of-chunk state update
        cw_h = cw_last[:, sl]                                          # (1, N)
        k_bar = k_h * cw_h
        b_bar = b_h * cw_h
        s_vk = lax.dot_general(v_h, k_bar, (((0,), (0,)), ((), ())),
                               preferred_element_type=f32)             # (N, N)
        s_sb = lax.dot_general(SA, b_bar, (((0,), (0,)), ((), ())),
                               preferred_element_type=f32)
        s_parts.append(S_h * cw_h + s_vk + s_sb)

    y_all = y_parts[0] if hp == 1 else jnp.concatenate(y_parts, axis=1)
    y_ref[...] = y_all.astype(y_ref.dtype)                    # lane-dense chunk store
    state_ref[...] = s_parts[0] if hp == 1 else jnp.concatenate(s_parts, axis=1)


def wkv7_logdecay(r, lw, k, v, a, b):
    """WKV-7 with the per-step log-decay lw = -exp(w) already precomputed."""
    B, T, C = r.shape
    assert T % CHUNK_LEN == 0
    N = HEAD_SIZE
    H = C // N
    hp = 4 if H % 4 == 0 else (2 if H % 2 == 0 else 1)   # 256-wide MXU on v6e/v7x
    W = hp * N
    G = C // W
    NC = T // CHUNK_LEN

    spec = pl.BlockSpec((None, CHUNK_LEN, W), lambda bi, gi, ci: (bi, ci, gi))
    return pl.pallas_call(
        functools.partial(_wkv7_chunk_kernel, hp=hp),
        out_shape=jax.ShapeDtypeStruct((B, T, C), jnp.float32),
        grid=(B, G, NC),
        in_specs=[spec] * 6,
        out_specs=spec,
        scratch_shapes=[pltpu.VMEM((N, W), jnp.float32)],    # packed fp32 state
        compiler_params=pltpu.CompilerParams(
            dimension_semantics=("parallel", "parallel", "arbitrary"),
            vmem_limit_bytes=32 * 1024 * 1024),
    )(lw, r, k, v, a, b)


def wkv7(r, w, k, v, a, b):
    """Pallas equivalent of RUN_CUDA_RWKV7g(q=r, w, k, v, a, b). All (B,T,C)."""
    return wkv7_logdecay(r, -jnp.exp(w), k, v, a, b)


def wkv7_reference(r, w, k, v, a, b):
    """Pure-JAX reference of the WKV-7 recurrence (for a correctness check)."""
    B, T, C = r.shape
    H = C // HEAD_SIZE
    N = HEAD_SIZE

    def head_fn(wh, qh, kh, vh, ah, bh):
        def step(S, inp):
            w_t, q_t, k_t, v_t, a_t, b_t = inp
            w_hat = jnp.exp(-jnp.exp(w_t))
            sa = jnp.sum(S * a_t[None, :], axis=1)
            S = (S * w_hat[None, :] + v_t[:, None] * k_t[None, :]
                 + sa[:, None] * b_t[None, :])
            y = jnp.sum(S * q_t[None, :], axis=1)
            return S, y
        S0 = jnp.zeros((N, N), jnp.float32)
        _, ys = lax.scan(step, S0, (wh, qh, kh, vh, ah, bh))
        return ys

    def to_heads(x):
        return x.reshape(B, T, H, N).transpose(0, 2, 1, 3).reshape(B * H, T, N)

    ys = jax.vmap(head_fn)(*map(to_heads, (w, r, k, v, a, b)))
    return ys.reshape(B, H, T, N).transpose(0, 2, 1, 3).reshape(B, T, C)


# ----------------------------------------------------------------------------
# Block forward (thin JAX glue around the Pallas kernels)
# ----------------------------------------------------------------------------
def time_shift(x):
    # nn.ZeroPad2d((0, 0, 1, -1)) on (B, T, C): out[:, t] = x[:, t-1], out[:, 0] = 0
    # TODO(synk): fold the shifted read into the mix-matmul index_map instead of
    # materializing a second full activation tensor in HBM.
    return jnp.concatenate([jnp.zeros_like(x[:, :1]), x[:, :-1]], axis=1)


def rwkv_tmix(p, x_bf, v_first, layer_id, args):
    B, T, C = x_bf.shape
    H = args['dim_att'] // args['head_size_a']
    N = args['head_size_a']
    BT = B * T

    xp = time_shift(x_bf).reshape(BT, C)       # previous-token activations (bf16)
    x2 = x_bf.reshape(BT, C)
    mm = pallas_matmul

    # projections with the token-shift mix fused into the matmul prologue
    r = mm(x2, p['Wr'], xprev=xp, mix=p['x_r'])
    k = mm(x2, p['Wk'], xprev=xp, mix=p['x_k'])
    v = mm(x2, p['Wv'], xprev=xp, mix=p['x_v'])
    # w LoRA fully fused: mix -> tanh(x@w1) -> @w2 + w0 -> log-decay -exp(w)
    lw = pallas_lora(x2, p['w1'], p['w2'], xprev=xp, mix=p['x_w'],
                     bias=p['w0'], act1='tanh', act2='logdecay')
    if layer_id == 0:
        v_first = v.reshape(B, T, C)
    else:
        gate_v = pallas_lora(x2, p['v1'], p['v2'], xprev=xp, mix=p['x_v'],
                             bias=p['v0'], act2='sigmoid')
        v = v + (v_first.reshape(BT, C) - v) * gate_v
    a = pallas_lora(x2, p['a1'], p['a2'], xprev=xp, mix=p['x_a'],
                    bias=p['a0'], act2='sigmoid')
    g = pallas_lora(x2, p['g1'], p['g2'], xprev=xp, mix=p['x_g'],
                    act1='sigmoid', out_dtype=jnp.bfloat16)

    kk = k * p['k_k']
    kk_h = kk.reshape(BT, H, N)
    nrm = jnp.sqrt(jnp.sum(kk_h * kk_h, axis=-1, keepdims=True))
    kk = (kk_h / jnp.maximum(nrm, 1e-12)).reshape(BT, C)      # F.normalize, p=2
    k2 = k * (1.0 + (a - 1.0) * p['k_a'])

    to3 = lambda t: t.reshape(B, T, C)
    y = wkv7_logdecay(to3(r), to3(lw), to3(k2), to3(v), to3(-kk), to3(kk * a))

    eps_gn = 1e-5 * (args['head_size_divisor'] ** 2)
    y = pallas_gn_bonus(y.reshape(BT, C), r, k2, v, p['r_k'],
                        p['gn_g'], p['gn_b'], eps_gn, H,
                        out_dtype=jnp.bfloat16)
    out = pallas_matmul(y, p['Wo'], mult=g)                   # (y*g) @ Wo fused
    return out.reshape(B, T, C), v_first


def rwkv_cmix(p, x_bf):
    B, T, C = x_bf.shape
    BT = B * T
    xp = time_shift(x_bf).reshape(BT, C)
    x2 = x_bf.reshape(BT, C)
    h = pallas_matmul(x2, p['Wk'], xprev=xp, mix=p['x_k'], act='relu_sq',
                      out_dtype=jnp.bfloat16)
    out = pallas_matmul(h, p['Wv'])
    return out.reshape(B, T, C)


def block_forward(params, x, v_first, layer_id, args):
    B, T, C = x.shape
    if layer_id == 0:
        x = pallas_layernorm(x.reshape(-1, C), params['ln0_g'],
                             params['ln0_b']).reshape(B, T, C)
    h = pallas_layernorm(x.reshape(-1, C), params['ln1_g'], params['ln1_b'],
                         out_dtype=jnp.bfloat16).reshape(B, T, C)
    att_out, v_first = rwkv_tmix(params['att'], h, v_first, layer_id, args)
    x = x + att_out
    h2 = pallas_layernorm(x.reshape(-1, C), params['ln2_g'], params['ln2_b'],
                          out_dtype=jnp.bfloat16).reshape(B, T, C)
    x = x + rwkv_cmix(params['ffn'], h2)
    return x, v_first


# ----------------------------------------------------------------------------
# Deterministic synthetic parameter init (shapes per the module __init__)
# ----------------------------------------------------------------------------
def init_block_params(key, args, layer_id):
    C = args['n_embd']
    H = args['dim_att'] // args['head_size_a']
    N = args['head_size_a']
    nl = args['n_layer']
    keys = iter(jax.random.split(key, 64))

    def nrm(shape, scale=0.02):
        return scale * jax.random.normal(next(keys), shape, dtype=jnp.float32)

    def unif(shape, a):
        return jax.random.uniform(next(keys), shape, jnp.float32, -a, a)

    def bfw(t):                      # matmul weights stored once as bf16
        return t.astype(jnp.bfloat16)

    ratio_0_to_1 = layer_id / (nl - 1)
    ratio_1_to_almost0 = 1.0 - layer_id / nl
    ddd = jnp.arange(C, dtype=jnp.float32) / C

    p = {}
    if layer_id == 0:
        p['ln0_g'] = 1.0 + nrm((C,), 0.1)
        p['ln0_b'] = nrm((C,), 0.1)
    p['ln1_g'] = 1.0 + nrm((C,), 0.1)
    p['ln1_b'] = nrm((C,), 0.1)
    p['ln2_g'] = 1.0 + nrm((C,), 0.1)
    p['ln2_b'] = nrm((C,), 0.1)

    att = {}
    att['x_r'] = 1.0 - ddd ** (0.2 * ratio_1_to_almost0)
    att['x_w'] = 1.0 - ddd ** (0.9 * ratio_1_to_almost0)
    att['x_k'] = 1.0 - (ddd ** (0.9 * ratio_1_to_almost0) + 0.4 * ratio_0_to_1)
    att['x_v'] = 1.0 - (ddd ** (0.4 * ratio_1_to_almost0) + 0.6 * ratio_0_to_1)
    att['x_a'] = 1.0 - ddd ** (0.9 * ratio_1_to_almost0)
    att['x_g'] = 1.0 - ddd ** (0.2 * ratio_1_to_almost0)
    D_DECAY, D_AAA, D_MV, D_GATE = 64, 64, 32, 128
    att['w1'] = bfw(nrm((C, D_DECAY)))
    att['w2'] = bfw(nrm((D_DECAY, C), 0.1))
    decay_speed = -7.0 + 5.0 * (jnp.arange(C, dtype=jnp.float32) / (C - 1)) ** (
        0.85 + 1.0 * ratio_0_to_1 ** 0.5)
    att['w0'] = decay_speed + 0.5
    att['a1'] = bfw(nrm((C, D_AAA)))
    att['a2'] = bfw(nrm((D_AAA, C), 0.1))
    att['a0'] = nrm((C,), 0.1)
    if layer_id != 0:
        att['v1'] = bfw(nrm((C, D_MV)))
        att['v2'] = bfw(nrm((D_MV, C), 0.1))
        att['v0'] = 1.0 + nrm((C,), 0.1)
    att['g1'] = bfw(nrm((C, D_GATE)))
    att['g2'] = bfw(nrm((D_GATE, C), 0.1))
    att['k_k'] = 0.85 * jnp.ones((C,), jnp.float32)
    att['k_a'] = jnp.ones((C,), jnp.float32)
    att['r_k'] = nrm((H, N), 0.1)
    # nn.Linear weights stored pre-transposed as (in, out) so y = x @ W
    att['Wr'] = bfw(unif((C, C), 0.5 / math.sqrt(C)))
    att['Wk'] = bfw(unif((C, C), 0.05 / math.sqrt(C)))
    att['Wv'] = bfw(unif((C, C), 0.5 / math.sqrt(C)))
    att['Wo'] = bfw(nrm((C, C), 0.02))     # torch zero-inits; small random here
    att['gn_g'] = 1.0 + nrm((C,), 0.1)
    att['gn_b'] = nrm((C,), 0.1)
    p['att'] = att

    ffn = {}
    ffn['x_k'] = 1.0 - ddd ** (ratio_1_to_almost0 ** 4)
    ffn['Wk'] = bfw(unif((C, 4 * C), 0.5 / math.sqrt(C)))
    ffn['Wv'] = bfw(nrm((4 * C, C), 0.02))  # torch zero-inits; small random here
    p['ffn'] = ffn
    return p


# ----------------------------------------------------------------------------
if __name__ == "__main__":
    args = dict(n_embd=128, dim_att=128, n_layer=2, head_size_a=64,
                head_size_divisor=8)
    B, T, C = 2, 16, args['n_embd']

    key = jax.random.PRNGKey(0)
    kx, k0, k1, kt = jax.random.split(key, 4)
    x = jax.random.normal(kx, (B, T, C), dtype=jnp.float32)
    params0 = init_block_params(k0, args, 0)
    params1 = init_block_params(k1, args, 1)

    # --- sanity check of the chunked WKV-7 Pallas kernel vs a pure-JAX scan ---
    ks = jax.random.split(kt, 6)
    r_t = 0.5 * jax.random.normal(ks[0], (B, T, C), jnp.float32)
    w_t = -0.5 - jax.nn.softplus(jax.random.normal(ks[1], (B, T, C), jnp.float32))
    k_t = 0.5 * jax.random.normal(ks[2], (B, T, C), jnp.float32)
    v_t = 0.5 * jax.random.normal(ks[3], (B, T, C), jnp.float32)
    kkh = jax.random.normal(ks[4], (B, T, C), jnp.float32).reshape(B, T, 2, 64)
    kkh = kkh / jnp.maximum(jnp.sqrt(jnp.sum(kkh * kkh, -1, keepdims=True)), 1e-12)
    kk_t = kkh.reshape(B, T, C)
    a_sig = jax.nn.sigmoid(jax.random.normal(ks[5], (B, T, C), jnp.float32))
    y_pal = wkv7(r_t, w_t, k_t, v_t, -kk_t, kk_t * a_sig)
    y_ref = wkv7_reference(r_t, w_t, k_t, v_t, -kk_t, kk_t * a_sig)
    diff = y_pal - y_ref
    max_err = float(jnp.max(jnp.abs(diff)))
    rel_err = float(jnp.linalg.norm(diff.ravel()) / jnp.linalg.norm(y_ref.ravel()))
    # tolerance accounts for default (non-HIGHEST) MXU matmul precision
    assert max_err < 1.5e-1 and rel_err < 3e-2, (max_err, rel_err)

    # --- run two chained Blocks (layer 0 then layer 1, as in the real model) ---
    @jax.jit
    def run(x):
        v_first = jnp.zeros_like(x)
        x, v_first = block_forward(params0, x, v_first, 0, args)
        x, v_first = block_forward(params1, x, v_first, 1, args)
        return x, v_first

    out, v_first = run(x)
    jax.block_until_ready(out)
    assert out.shape == (B, T, C) and v_first.shape == (B, T, C)
    assert bool(jnp.all(jnp.isfinite(out)))
    print("KERNEL_OK")
</pallas_src>

<mosaic_0001>
module attributes {stable_mosaic.version = 11 : i64} {
  func.func @_wkv7_chunk_kernel(%arg0: i32, %arg1: i32, %arg2: i32, %arg3: memref<1x16x128xf32, #tpu.memory_space<vmem>>, %arg4: memref<1x16x128xf32, #tpu.memory_space<vmem>>, %arg5: memref<1x16x128xf32, #tpu.memory_space<vmem>>, %arg6: memref<1x16x128xf32, #tpu.memory_space<vmem>>, %arg7: memref<1x16x128xf32, #tpu.memory_space<vmem>>, %arg8: memref<1x16x128xf32, #tpu.memory_space<vmem>>, %arg9: memref<1x16x128xf32, #tpu.memory_space<vmem>>, %arg10: memref<64x128xf32, #tpu.memory_space<vmem>>) attributes {dimension_semantics = [#tpu.dimension_semantics<parallel>, #tpu.dimension_semantics<parallel>, #tpu.dimension_semantics<arbitrary>], iteration_bounds = array<i64: 2, 1, 1>, scalar_prefetch = 0 : i64, scratch_operands = 1 : i64, tpu.core_type = #tpu.core_type<tc>, window_params = [{transform_indices = @transform_0, window_bounds = array<i64: 1, 16, 128>}, {transform_indices = @transform_1, window_bounds = array<i64: 1, 16, 128>}, {transform_indices = @transform_2, window_bounds = array<i64: 1, 16, 128>}, {transform_indices = @transform_3, window_bounds = array<i64: 1, 16, 128>}, {transform_indices = @transform_4, window_bounds = array<i64: 1, 16, 128>}, {transform_indices = @transform_5, window_bounds = array<i64: 1, 16, 128>}, {transform_indices = @transform_6, window_bounds = array<i64: 1, 16, 128>}]} {
    %c0_i32 = arith.constant 0 : i32
    %0 = arith.cmpi eq, %arg2, %c0_i32 : i32
    %1 = arith.extui %0 : i1 to i32
    %c0_i32_0 = arith.constant 0 : i32
    %2 = arith.cmpi ne, %1, %c0_i32_0 : i32
    scf.if %2 {
      %cst_62 = arith.constant 0.000000e+00 : f32
      %134 = vector.broadcast %cst_62 : f32 to vector<64x128xf32>
      %c0_63 = arith.constant 0 : index
      %c0_64 = arith.constant 0 : index
      %135 = vector.load %arg10[%c0_63, %c0_64] : memref<64x128xf32, #tpu.memory_space<vmem>>, vector<64x128xf32>
      tpu.vector_store %arg10[%c0_63, %c0_64], %134 {strides = array<i32>} : memref<64x128xf32, #tpu.memory_space<vmem>>, vector<64x128xf32>,
    } else {
    }
    %3 = tpu.iota {dimensions = array<i32: 0>} : vector<16x16xi32>
    %4 = tpu.iota {dimensions = array<i32: 1>} : vector<16x16xi32>
    %5 = arith.cmpi sle, %4, %3 : vector<16x16xi32>
    %6 = arith.extui %5 : vector<16x16xi1> to vector<16x16xi32>
    %7 = arith.sitofp %6 : vector<16x16xi32> to vector<16x16xf32>
    %8 = arith.cmpi slt, %4, %3 : vector<16x16xi32>
    %9 = arith.extui %8 : vector<16x16xi1> to vector<16x16xi32>
    %10 = arith.sitofp %9 : vector<16x16xi32> to vector<16x16xf32>
    %11 = arith.cmpi eq, %4, %3 : vector<16x16xi32>
    %12 = arith.extui %11 : vector<16x16xi1> to vector<16x16xi32>
    %13 = arith.sitofp %12 : vector<16x16xi32> to vector<16x16xf32>
    %c0 = arith.constant 0 : index
    %c0_1 = arith.constant 0 : index
    %c0_2 = arith.constant 0 : index
    %14 = vector.load %arg3[%c0, %c0_1, %c0_2] : memref<1x16x128xf32, #tpu.memory_space<vmem>>, vector<1x16x128xf32>
    %15 = vector.shape_cast %14 : vector<1x16x128xf32> to vector<16x128xf32>
    %cst = arith.constant dense<0.000000e+00> : vector<16x128xf32>
    %16 = tpu.matmul %7, %15, %cst {dimension_numbers = #tpu.dot_dimension_numbers<[1], [0], [0], [1], [0, 0, 1, 1], [], []>} : vector<16x16xf32>, vector<16x128xf32>, vector<16x128xf32> -> vector<16x128xf32>
    %17 = arith.subf %16, %15 : vector<16x128xf32>
    %18 = vector.extract_strided_slice %16 {offsets = [15, 0], sizes = [1, 128], strides = [1, 1]} : vector<16x128xf32> to vector<1x128xf32>
    %19 = math.exp %18 : vector<1x128xf32>
    %c0_3 = arith.constant 0 : index
    %c0_4 = arith.constant 0 : index
    %c0_5 = arith.constant 0 : index
    %20 = vector.load %arg4[%c0_3, %c0_4, %c0_5] : memref<1x16x128xf32, #tpu.memory_space<vmem>>, vector<1x16x128xf32>
    %21 = vector.shape_cast %20 : vector<1x16x128xf32> to vector<16x128xf32>
    %22 = math.exp %16 : vector<16x128xf32>
    %23 = arith.mulf %21, %22 : vector<16x128xf32>
    %c0_6 = arith.constant 0 : index
    %c0_7 = arith.constant 0 : index
    %c0_8 = arith.constant 0 : index
    %24 = vector.load %arg7[%c0_6, %c0_7, %c0_8] : memref<1x16x128xf32, #tpu.memory_space<vmem>>, vector<1x16x128xf32>
    %25 = vector.shape_cast %24 : vector<1x16x128xf32> to vector<16x128xf32>
    %26 = math.exp %17 : vector<16x128xf32>
    %27 = arith.mulf %25, %26 : vector<16x128xf32>
    %cst_9 = arith.constant 0.000000e+00 : f32
    %28 = vector.broadcast %cst_9 : f32 to vector<16x128xf32>
    %29 = arith.subf %28, %16 : vector<16x128xf32>
    %30 = math.exp %29 : vector<16x128xf32>
    %c0_10 = arith.constant 0 : index
    %c0_11 = arith.constant 0 : index
    %c0_12 = arith.constant 0 : index
    %31 = vector.load %arg5[%c0_10, %c0_11, %c0_12] : memref<1x16x128xf32, #tpu.memory_space<vmem>>, vector<1x16x128xf32>
    %32 = vector.shape_cast %31 : vector<1x16x128xf32> to vector<16x128xf32>
    %33 = arith.mulf %32, %30 : vector<16x128xf32>
    %c0_13 = arith.constant 0 : index
    %c0_14 = arith.constant 0 : index
    %c0_15 = arith.constant 0 : index
    %34 = vector.load %arg8[%c0_13, %c0_14, %c0_15] : memref<1x16x128xf32, #tpu.memory_space<vmem>>, vector<1x16x128xf32>
    %35 = vector.shape_cast %34 : vector<1x16x128xf32> to vector<16x128xf32>
    %36 = arith.mulf %35, %30 : vector<16x128xf32>
    %c0_16 = arith.constant 0 : index
    %c0_17 = arith.constant 0 : index
    %c0_18 = arith.constant 0 : index
    %37 = vector.load %arg6[%c0_16, %c0_17, %c0_18] : memref<1x16x128xf32, #tpu.memory_space<vmem>>, vector<1x16x128xf32>
    %38 = vector.shape_cast %37 : vector<1x16x128xf32> to vector<16x128xf32>
    %c0_19 = arith.constant 0 : index
    %c0_20 = arith.constant 0 : index
    %39 = vector.load %arg10[%c0_19, %c0_20] : memref<64x128xf32, #tpu.memory_space<vmem>>, vector<64x128xf32>
    %40 = vector.extract_strided_slice %27 {offsets = [0, 0], sizes = [16, 64], strides = [1, 1]} : vector<16x128xf32> to vector<16x64xf32>
    %41 = vector.extract_strided_slice %23 {offsets = [0, 0], sizes = [16, 64], strides = [1, 1]} : vector<16x128xf32> to vector<16x64xf32>
    %42 = vector.extract_strided_slice %33 {offsets = [0, 0], sizes = [16, 64], strides = [1, 1]} : vector<16x128xf32> to vector<16x64xf32>
    %43 = vector.extract_strided_slice %36 {offsets = [0, 0], sizes = [16, 64], strides = [1, 1]} : vector<16x128xf32> to vector<16x64xf32>
    %44 = vector.extract_strided_slice %38 {offsets = [0, 0], sizes = [16, 64], strides = [1, 1]} : vector<16x128xf32> to vector<16x64xf32>
    %45 = vector.extract_strided_slice %39 {offsets = [0, 0], sizes = [64, 64], strides = [1, 1]} : vector<64x128xf32> to vector<64x64xf32>
    %cst_21 = arith.constant dense<0.000000e+00> : vector<16x64xf32>
    %46 = tpu.matmul %40, %45, %cst_21 {dimension_numbers = #tpu.dot_dimension_numbers<[1], [1], [0], [0], [0, 0, 1, 0], [], []>} : vector<16x64xf32>, vector<64x64xf32>, vector<16x64xf32> -> vector<16x64xf32>
    %cst_22 = arith.constant dense<0.000000e+00> : vector<16x64xf32>
    %47 = tpu.matmul %41, %45, %cst_22 {dimension_numbers = #tpu.dot_dimension_numbers<[1], [1], [0], [0], [0, 0, 1, 0], [], []>} : vector<16x64xf32>, vector<64x64xf32>, vector<16x64xf32> -> vector<16x64xf32>
    %cst_23 = arith.constant dense<0.000000e+00> : vector<16x16xf32>
    %48 = tpu.matmul %40, %42, %cst_23 {dimension_numbers = #tpu.dot_dimension_numbers<[1], [1], [0], [0], [0, 0, 1, 0], [], []>} : vector<16x64xf32>, vector<16x64xf32>, vector<16x16xf32> -> vector<16x16xf32>
    %49 = arith.mulf %48, %10 : vector<16x16xf32>
    %cst_24 = arith.constant dense<0.000000e+00> : vector<16x16xf32>
    %50 = tpu.matmul %40, %43, %cst_24 {dimension_numbers = #tpu.dot_dimension_numbers<[1], [1], [0], [0], [0, 0, 1, 0], [], []>} : vector<16x64xf32>, vector<16x64xf32>, vector<16x16xf32> -> vector<16x16xf32>
    %51 = arith.mulf %50, %10 : vector<16x16xf32>
    %cst_25 = arith.constant dense<0.000000e+00> : vector<16x16xf32>
    %52 = tpu.matmul %41, %42, %cst_25 {dimension_numbers = #tpu.dot_dimension_numbers<[1], [1], [0], [0], [0, 0, 1, 0], [], []>} : vector<16x64xf32>, vector<16x64xf32>, vector<16x16xf32> -> vector<16x16xf32>
    %53 = arith.mulf %52, %7 : vector<16x16xf32>
    %cst_26 = arith.constant dense<0.000000e+00> : vector<16x16xf32>
    %54 = tpu.matmul %41, %43, %cst_26 {dimension_numbers = #tpu.dot_dimension_numbers<[1], [1], [0], [0], [0, 0, 1, 0], [], []>} : vector<16x64xf32>, vector<16x64xf32>, vector<16x16xf32> -> vector<16x16xf32>
    %55 = arith.mulf %54, %7 : vector<16x16xf32>
    %56 = arith.addf %13, %51 : vector<16x16xf32>
    %cst_27 = arith.constant dense<0.000000e+00> : vector<16x16xf32>
    %57 = tpu.matmul %51, %51, %cst_27 {dimension_numbers = #tpu.dot_dimension_numbers<[1], [0], [0], [1], [0, 0, 1, 1], [], []>} : vector<16x16xf32>, vector<16x16xf32>, vector<16x16xf32> -> vector<16x16xf32>
    %cst_28 = arith.constant dense<0.000000e+00> : vector<16x16xf32>
    %58 = tpu.matmul %56, %57, %cst_28 {dimension_numbers = #tpu.dot_dimension_numbers<[1], [0], [0], [1], [0, 0, 1, 1], [], []>} : vector<16x16xf32>, vector<16x16xf32>, vector<16x16xf32> -> vector<16x16xf32>
    %59 = arith.addf %56, %58 : vector<16x16xf32>
    %cst_29 = arith.constant dense<0.000000e+00> : vector<16x16xf32>
    %60 = tpu.matmul %57, %57, %cst_29 {dimension_numbers = #tpu.dot_dimension_numbers<[1], [0], [0], [1], [0, 0, 1, 1], [], []>} : vector<16x16xf32>, vector<16x16xf32>, vector<16x16xf32> -> vector<16x16xf32>
    %cst_30 = arith.constant dense<0.000000e+00> : vector<16x16xf32>
    %61 = tpu.matmul %59, %60, %cst_30 {dimension_numbers = #tpu.dot_dimension_numbers<[1], [0], [0], [1], [0, 0, 1, 1], [], []>} : vector<16x16xf32>, vector<16x16xf32>, vector<16x16xf32> -> vector<16x16xf32>
    %62 = arith.addf %59, %61 : vector<16x16xf32>
    %cst_31 = arith.constant dense<0.000000e+00> : vector<16x16xf32>
    %63 = tpu.matmul %60, %60, %cst_31 {dimension_numbers = #tpu.dot_dimension_numbers<[1], [0], [0], [1], [0, 0, 1, 1], [], []>} : vector<16x16xf32>, vector<16x16xf32>, vector<16x16xf32> -> vector<16x16xf32>
    %cst_32 = arith.constant dense<0.000000e+00> : vector<16x16xf32>
    %64 = tpu.matmul %62, %63, %cst_32 {dimension_numbers = #tpu.dot_dimension_numbers<[1], [0], [0], [1], [0, 0, 1, 1], [], []>} : vector<16x16xf32>, vector<16x16xf32>, vector<16x16xf32> -> vector<16x16xf32>
    %65 = arith.addf %62, %64 : vector<16x16xf32>
    %cst_33 = arith.constant dense<0.000000e+00> : vector<16x64xf32>
    %66 = tpu.matmul %49, %44, %cst_33 {dimension_numbers = #tpu.dot_dimension_numbers<[1], [0], [0], [1], [0, 0, 1, 1], [], []>} : vector<16x16xf32>, vector<16x64xf32>, vector<16x64xf32> -> vector<16x64xf32>
    %67 = arith.addf %46, %66 : vector<16x64xf32>
    %cst_34 = arith.constant dense<0.000000e+00> : vector<16x64xf32>
    %68 = tpu.matmul %65, %67, %cst_34 {dimension_numbers = #tpu.dot_dimension_numbers<[1], [0], [0], [1], [0, 0, 1, 1], [], []>} : vector<16x16xf32>, vector<16x64xf32>, vector<16x64xf32> -> vector<16x64xf32>
    %cst_35 = arith.constant dense<0.000000e+00> : vector<16x64xf32>
    %69 = tpu.matmul %53, %44, %cst_35 {dimension_numbers = #tpu.dot_dimension_numbers<[1], [0], [0], [1], [0, 0, 1, 1], [], []>} : vector<16x16xf32>, vector<16x64xf32>, vector<16x64xf32> -> vector<16x64xf32>
    %70 = arith.addf %47, %69 : vector<16x64xf32>
    %cst_36 = arith.constant dense<0.000000e+00> : vector<16x64xf32>
    %71 = tpu.matmul %55, %68, %cst_36 {dimension_numbers = #tpu.dot_dimension_numbers<[1], [0], [0], [1], [0, 0, 1, 1], [], []>} : vector<16x16xf32>, vector<16x64xf32>, vector<16x64xf32> -> vector<16x64xf32>
    %72 = arith.addf %70, %71 : vector<16x64xf32>
    %73 = vector.extract_strided_slice %19 {offsets = [0, 0], sizes = [1, 64], strides = [1, 1]} : vector<1x128xf32> to vector<1x64xf32>
    %74 = vector.broadcast %73 : vector<1x64xf32> to vector<16x64xf32>
    %75 = arith.mulf %42, %74 : vector<16x64xf32>
    %76 = vector.broadcast %73 : vector<1x64xf32> to vector<16x64xf32>
    %77 = arith.mulf %43, %76 : vector<16x64xf32>
    %cst_37 = arith.constant dense<0.000000e+00> : vector<64x64xf32>
    %78 = tpu.matmul %44, %75, %cst_37 {dimension_numbers = #tpu.dot_dimension_numbers<[0], [0], [1], [1], [0, 1, 1, 1], [], []>} : vector<16x64xf32>, vector<16x64xf32>, vector<64x64xf32> -> vector<64x64xf32>
    %cst_38 = arith.constant dense<0.000000e+00> : vector<64x64xf32>
    %79 = tpu.matmul %68, %77, %cst_38 {dimension_numbers = #tpu.dot_dimension_numbers<[0], [0], [1], [1], [0, 1, 1, 1], [], []>} : vector<16x64xf32>, vector<16x64xf32>, vector<64x64xf32> -> vector<64x64xf32>
    %80 = vector.broadcast %73 : vector<1x64xf32> to vector<64x64xf32>
    %81 = arith.mulf %45, %80 : vector<64x64xf32>
    %82 = arith.addf %81, %78 : vector<64x64xf32>
    %83 = arith.addf %82, %79 : vector<64x64xf32>
    %84 = vector.extract_strided_slice %27 {offsets = [0, 64], sizes = [16, 64], strides = [1, 1]} : vector<16x128xf32> to vector<16x64xf32>
    %85 = vector.extract_strided_slice %23 {offsets = [0, 64], sizes = [16, 64], strides = [1, 1]} : vector<16x128xf32> to vector<16x64xf32>
    %86 = vector.extract_strided_slice %33 {offsets = [0, 64], sizes = [16, 64], strides = [1, 1]} : vector<16x128xf32> to vector<16x64xf32>
    %87 = vector.extract_strided_slice %36 {offsets = [0, 64], sizes = [16, 64], strides = [1, 1]} : vector<16x128xf32> to vector<16x64xf32>
    %88 = vector.extract_strided_slice %38 {offsets = [0, 64], sizes = [16, 64], strides = [1, 1]} : vector<16x128xf32> to vector<16x64xf32>
    %89 = vector.extract_strided_slice %39 {offsets = [0, 64], sizes = [64, 64], strides = [1, 1]} : vector<64x128xf32> to vector<64x64xf32>
    %cst_39 = arith.constant dense<0.000000e+00> : vector<16x64xf32>
    %90 = tpu.matmul %84, %89, %cst_39 {dimension_numbers = #tpu.dot_dimension_numbers<[1], [1], [0], [0], [0, 0, 1, 0], [], []>} : vector<16x64xf32>, vector<64x64xf32>, vector<16x64xf32> -> vector<16x64xf32>
    %cst_40 = arith.constant dense<0.000000e+00> : vector<16x64xf32>
    %91 = tpu.matmul %85, %89, %cst_40 {dimension_numbers = #tpu.dot_dimension_numbers<[1], [1], [0], [0], [0, 0, 1, 0], [], []>} : vector<16x64xf32>, vector<64x64xf32>, vector<16x64xf32> -> vector<16x64xf32>
    %cst_41 = arith.constant dense<0.000000e+00> : vector<16x16xf32>
    %92 = tpu.matmul %84, %86, %cst_41 {dimension_numbers = #tpu.dot_dimension_numbers<[1], [1], [0], [0], [0, 0, 1, 0], [], []>} : vector<16x64xf32>, vector<16x64xf32>, vector<16x16xf32> -> vector<16x16xf32>
    %93 = arith.mulf %92, %10 : vector<16x16xf32>
    %cst_42 = arith.constant dense<0.000000e+00> : vector<16x16xf32>
    %94 = tpu.matmul %84, %87, %cst_42 {dimension_numbers = #tpu.dot_dimension_numbers<[1], [1], [0], [0], [0, 0, 1, 0], [], []>} : vector<16x64xf32>, vector<16x64xf32>, vector<16x16xf32> -> vector<16x16xf32>
    %95 = arith.mulf %94, %10 : vector<16x16xf32>
    %cst_43 = arith.constant dense<0.000000e+00> : vector<16x16xf32>
    %96 = tpu.matmul %85, %86, %cst_43 {dimension_numbers = #tpu.dot_dimension_numbers<[1], [1], [0], [0], [0, 0, 1, 0], [], []>} : vector<16x64xf32>, vector<16x64xf32>, vector<16x16xf32> -> vector<16x16xf32>
    %97 = arith.mulf %96, %7 : vector<16x16xf32>
    %cst_44 = arith.constant dense<0.000000e+00> : vector<16x16xf32>
    %98 = tpu.matmul %85, %87, %cst_44 {dimension_numbers = #tpu.dot_dimension_numbers<[1], [1], [0], [0], [0, 0, 1, 0], [], []>} : vector<16x64xf32>, vector<16x64xf32>, vector<16x16xf32> -> vector<16x16xf32>
    %99 = arith.mulf %98, %7 : vector<16x16xf32>
    %100 = arith.addf %13, %95 : vector<16x16xf32>
    %cst_45 = arith.constant dense<0.000000e+00> : vector<16x16xf32>
    %101 = tpu.matmul %95, %95, %cst_45 {dimension_numbers = #tpu.dot_dimension_numbers<[1], [0], [0], [1], [0, 0, 1, 1], [], []>} : vector<16x16xf32>, vector<16x16xf32>, vector<16x16xf32> -> vector<16x16xf32>
    %cst_46 = arith.constant dense<0.000000e+00> : vector<16x16xf32>
    %102 = tpu.matmul %100, %101, %cst_46 {dimension_numbers = #tpu.dot_dimension_numbers<[1], [0], [0], [1], [0, 0, 1, 1], [], []>} : vector<16x16xf32>, vector<16x16xf32>, vector<16x16xf32> -> vector<16x16xf32>
    %103 = arith.addf %100, %102 : vector<16x16xf32>
    %cst_47 = arith.constant dense<0.000000e+00> : vector<16x16xf32>
    %104 = tpu.matmul %101, %101, %cst_47 {dimension_numbers = #tpu.dot_dimension_numbers<[1], [0], [0], [1], [0, 0, 1, 1], [], []>} : vector<16x16xf32>, vector<16x16xf32>, vector<16x16xf32> -> vector<16x16xf32>
    %cst_48 = arith.constant dense<0.000000e+00> : vector<16x16xf32>
    %105 = tpu.matmul %103, %104, %cst_48 {dimension_numbers = #tpu.dot_dimension_numbers<[1], [0], [0], [1], [0, 0, 1, 1], [], []>} : vector<16x16xf32>, vector<16x16xf32>, vector<16x16xf32> -> vector<16x16xf32>
    %106 = arith.addf %103, %105 : vector<16x16xf32>
    %cst_49 = arith.constant dense<0.000000e+00> : vector<16x16xf32>
    %107 = tpu.matmul %104, %104, %cst_49 {dimension_numbers = #tpu.dot_dimension_numbers<[1], [0], [0], [1], [0, 0, 1, 1], [], []>} : vector<16x16xf32>, vector<16x16xf32>, vector<16x16xf32> -> vector<16x16xf32>
    %cst_50 = arith.constant dense<0.000000e+00> : vector<16x16xf32>
    %108 = tpu.matmul %106, %107, %cst_50 {dimension_numbers = #tpu.dot_dimension_numbers<[1], [0], [0], [1], [0, 0, 1, 1], [], []>} : vector<16x16xf32>, vector<16x16xf32>, vector<16x16xf32> -> vector<16x16xf32>
    %109 = arith.addf %106, %108 : vector<16x16xf32>
    %cst_51 = arith.constant dense<0.000000e+00> : vector<16x64xf32>
    %110 = tpu.matmul %93, %88, %cst_51 {dimension_numbers = #tpu.dot_dimension_numbers<[1], [0], [0], [1], [0, 0, 1, 1], [], []>} : vector<16x16xf32>, vector<16x64xf32>, vector<16x64xf32> -> vector<16x64xf32>
    %111 = arith.addf %90, %110 : vector<16x64xf32>
    %cst_52 = arith.constant dense<0.000000e+00> : vector<16x64xf32>
    %112 = tpu.matmul %109, %111, %cst_52 {dimension_numbers = #tpu.dot_dimension_numbers<[1], [0], [0], [1], [0, 0, 1, 1], [], []>} : vector<16x16xf32>, vector<16x64xf32>, vector<16x64xf32> -> vector<16x64xf32>
    %cst_53 = arith.constant dense<0.000000e+00> : vector<16x64xf32>
    %113 = tpu.matmul %97, %88, %cst_53 {dimension_numbers = #tpu.dot_dimension_numbers<[1], [0], [0], [1], [0, 0, 1, 1], [], []>} : vector<16x16xf32>, vector<16x64xf32>, vector<16x64xf32> -> vector<16x64xf32>
    %114 = arith.addf %91, %113 : vector<16x64xf32>
    %cst_54 = arith.constant dense<0.000000e+00> : vector<16x64xf32>
    %115 = tpu.matmul %99, %112, %cst_54 {dimension_numbers = #tpu.dot_dimension_numbers<[1], [0], [0], [1], [0, 0, 1, 1], [], []>} : vector<16x16xf32>, vector<16x64xf32>, vector<16x64xf32> -> vector<16x64xf32>
    %116 = arith.addf %114, %115 : vector<16x64xf32>
    %117 = vector.extract_strided_slice %19 {offsets = [0, 64], sizes = [1, 64], strides = [1, 1]} : vector<1x128xf32> to vector<1x64xf32>
    %118 = vector.broadcast %117 : vector<1x64xf32> to vector<16x64xf32>
    %119 = arith.mulf %86, %118 : vector<16x64xf32>
    %120 = vector.broadcast %117 : vector<1x64xf32> to vector<16x64xf32>
    %121 = arith.mulf %87, %120 : vector<16x64xf32>
    %cst_55 = arith.constant dense<0.000000e+00> : vector<64x64xf32>
    %122 = tpu.matmul %88, %119, %cst_55 {dimension_numbers = #tpu.dot_dimension_numbers<[0], [0], [1], [1], [0, 1, 1, 1], [], []>} : vector<16x64xf32>, vector<16x64xf32>, vector<64x64xf32> -> vector<64x64xf32>
    %cst_56 = arith.constant dense<0.000000e+00> : vector<64x64xf32>
    %123 = tpu.matmul %112, %121, %cst_56 {dimension_numbers = #tpu.dot_dimension_numbers<[0], [0], [1], [1], [0, 1, 1, 1], [], []>} : vector<16x64xf32>, vector<16x64xf32>, vector<64x64xf32> -> vector<64x64xf32>
    %124 = vector.broadcast %117 : vector<1x64xf32> to vector<64x64xf32>
    %125 = arith.mulf %89, %124 : vector<64x64xf32>
    %126 = arith.addf %125, %122 : vector<64x64xf32>
    %127 = arith.addf %126, %123 : vector<64x64xf32>
    %128 = tpu.concatenate %72, %116 in 1 : vector<16x64xf32>, vector<16x64xf32> -> vector<16x128xf32>
    %c0_57 = arith.constant 0 : index
    %c0_58 = arith.constant 0 : index
    %c0_59 = arith.constant 0 : index
    %129 = vector.load %arg9[%c0_57, %c0_58, %c0_59] : memref<1x16x128xf32, #tpu.memory_space<vmem>>, vector<1x16x128xf32>
    %130 = vector.shape_cast %129 : vector<1x16x128xf32> to vector<16x128xf32>
    %131 = vector.shape_cast %128 : vector<16x128xf32> to vector<1x16x128xf32>
    tpu.vector_store %arg9[%c0_57, %c0_58, %c0_59], %131 {strides = array<i32>} : memref<1x16x128xf32, #tpu.memory_space<vmem>>, vector<1x16x128xf32>,
    %132 = tpu.concatenate %83, %127 in 1 : vector<64x64xf32>, vector<64x64xf32> -> vector<64x128xf32>
    %c0_60 = arith.constant 0 : index
    %c0_61 = arith.constant 0 : index
    %133 = vector.load %arg10[%c0_60, %c0_61] : memref<64x128xf32, #tpu.memory_space<vmem>>, vector<64x128xf32>
    tpu.vector_store %arg10[%c0_60, %c0_61], %132 {strides = array<i32>} : memref<64x128xf32, #tpu.memory_space<vmem>>, vector<64x128xf32>,
    return
  }
  func.func @transform_0(%arg0: i32, %arg1: i32, %arg2: i32) -> (i32, i32, i32) {
    %c0_i32 = arith.constant 0 : i32
    return %arg0, %arg2, %arg1 : i32, i32, i32
  }
  func.func @transform_1(%arg0: i32, %arg1: i32, %arg2: i32) -> (i32, i32, i32) {
    %c0_i32 = arith.constant 0 : i32
    return %arg0, %arg2, %arg1 : i32, i32, i32
  }
  func.func @transform_2(%arg0: i32, %arg1: i32, %arg2: i32) -> (i32, i32, i32) {
    %c0_i32 = arith.constant 0 : i32
    return %arg0, %arg2, %arg1 : i32, i32, i32
  }
  func.func @transform_3(%arg0: i32, %arg1: i32, %arg2: i32) -> (i32, i32, i32) {
    %c0_i32 = arith.constant 0 : i32
    return %arg0, %arg2, %arg1 : i32, i32, i32
  }
  func.func @transform_4(%arg0: i32, %arg1: i32, %arg2: i32) -> (i32, i32, i32) {
    %c0_i32 = arith.constant 0 : i32
    return %arg0, %arg2, %arg1 : i32, i32, i32
  }
  func.func @transform_5(%arg0: i32, %arg1: i32, %arg2: i32) -> (i32, i32, i32) {
    %c0_i32 = arith.constant 0 : i32
    return %arg0, %arg2, %arg1 : i32, i32, i32
  }
  func.func @transform_6(%arg0: i32, %arg1: i32, %arg2: i32) -> (i32, i32, i32) {
    %c0_i32 = arith.constant 0 : i32
    return %arg0, %arg2, %arg1 : i32, i32, i32
  }
}

</mosaic_0001>

<bundles_post_ra>
// kernel: tpu_custom_call.1
= control target key start
LH: loop header
LB: loop body
LE: loop exit
PB: predicated region body
PF: predicated region fallthrough
CT: control target
= control target key end

     0   :  { %s6632_s0 = inlined_call_operand.hbm [shape: f32[2,16,128], index: 0, kind: input, shape index: {}]   ;;  %s6633_s1 = inlined_call_operand.hbm [shape: f32[2,16,128], index: 1, kind: input, shape index: {}]   ;;  %s6634_s2 = inlined_call_operand.hbm [shape: f32[2,16,128], index: 2, kind: input, shape index: {}]   ;;  %s6635_s3 = inlined_call_operand.hbm [shape: f32[2,16,128], index: 3, kind: input, shape index: {}]   ;;  %s6636_s4 = inlined_call_operand.hbm [shape: f32[2,16,128], index: 4, kind: input, shape index: {}]   ;;  %s6637_s5 = inlined_call_operand.hbm [shape: f32[2,16,128], index: 5, kind: input, shape index: {}]   ;;  %s6638_s6 = inlined_call_operand.hbm [shape: f32[2,16,128], index: 6, kind: output, shape index: {}]  }
   0x1   :  { %6652 = sst [smem:[#allocation26_spill]] %s6633_s1 }
   0x2   :  { %6653 = sst [smem:[#allocation27_spill]] %s6635_s3 }
   0x3   :  { %11 = vsyncpa [#allocation4], 0 }
   0x4   :  { %13 = vsyncpa [#allocation4 + $0x1], 0 }
   0x5   :  { %14 = vsyncpa [#allocation7], 0 }
   0x6   :  { %16 = vsyncpa [#allocation7 + $0x1], 0 }
   0x7   :  { %17 = vsyncpa [#allocation10], 0 }
   0x8   :  { %19 = vsyncpa [#allocation10 + $0x1], 0 }
   0x9   :  { %20 = vsyncpa [#allocation13], 0 }
   0xa   :  { %22 = vsyncpa [#allocation13 + $0x1], 0 }
   0xb   :  { %23 = vsyncpa [#allocation5], 0 }
   0xc   :  { %25 = vsyncpa [#allocation5 + $0x1], 0  ;;  %s5780_s21 = smov 0   ;;  %s5782_s22 = smov 0  }
   0xd   :  { %s5784_s23 = smov 0   ;;  %s5786_s24 = smov 0  }
   0xe   :  { %s5788_s25 = smov 0   ;;  %s5790_s26 = smov 0  }
   0xf LB: > { %6654 = sst [smem:[#allocation20_spill]] %s5718_s23  ;;  %s5811_s27 = sadd.s32 4294967295, %s5730_s26   ;;  %s5730_s26 = sphi %s5790_s26, %s31_s26   ;;  %s5726_s25 = sphi %s5788_s25, %s6686_s25   ;;  %s5722_s24 = sphi %s5786_s24, %s6685_s24   ;;  %s5718_s23 = sphi %s5784_s23, %s6684_s23   ;;  %s5714_s22 = sphi %s5782_s22, %s6688_s22   ;;  %s5710_s21 = sphi %s5780_s21, %s6687_s21  }
  0x10   : > { %6655 = sst [smem:[#allocation21_spill]] %s5726_s25  ;;  %s4413_s28 = sadd.s32 4294967294, %s5730_s26  }
  0x11   : > { %6656 = sst [smem:[#allocation22_spill]] %s5730_s26  ;;  %s50_s29 = sadd.s32 1, %s5726_s25 }
  0x12   : > { %s61_s30 = sadd.s32 1, %s5718_s23  ;;  %p52_p0 = scmp.ge.s32.totalorder %s50_s29, 2 }
  0x13   : > { %p68_p1 = scmp.ne.s32.totalorder %s5718_s23, %s5714_s22  ;;  %p69_p2 = scmp.eq.s32.totalorder %s5730_s26, 0 }
  0x14   : > { %p74_p3 = scmp.ne.s32.totalorder %s5714_s22, %s5710_s21  ;;  %s6690_s29 = smov (%p52_p0, %s50_s29), 0 }
  0x15   : > { %6657 = sst [smem:[#allocation23_spill]] %s6690_s29  ;;  %p5823_p4 = por %p69_p2, %p68_p1 }
  0x16   : > { %p75_p5 = scmp.eq.s32.totalorder %s5811_s27, 0  ;;  %s54_s8 = ssub.s32 %s5726_s25, %s6690_s29 }
  0x17   : > { %p252_p6 = scmp.eq.s32.totalorder %s5811_s27, 1  ;;  %p59_p7 = scmp.eq.s32.totalorder %s54_s8, 0 }
  0x18   : > { %p5831_p8 = por %p75_p5, %p74_p3  ;;  %p258_p10 = scmp.eq.s32.totalorder %s4413_s28, 1 }
  0x19   : > { %p5835_p9 = por %p252_p6, %p68_p1  ;;  %p5348_p13 = scmp.lt.s32.totalorder %s5730_s26, 2 }
  0x1a   : > { %s6659_s9 = scalar_select %p5831_p8, 1, 0 }
  0x1b   : > { %s6660_s10 = scalar_select %p5835_p9, 1, 0 }
  0x1c   : > { %s5840_s11 = scalar_select %p59_p7, %s5718_s23, %s61_s30  }
  0x1d   : > { %p5842_p11 = por %p258_p10, %p74_p3  ;;  %s5849_s13 = sand.u32 1, %s5718_s23  }
  0x1e   : > { %6661 = sst [smem:[#allocation24_spill]] %s5840_s11  ;;  %s5852_s14 = sshll.u32 %s5849_s13, 4 }
  0x1f   : > { %s6662_s12 = scalar_select %p5842_p11, 1, 0 }
  0x20   : > { %s5855_s15 = sshll.u32 %s5726_s25, 8  ;;  %p5859_p0 = pnand %p5348_p13, %p5823_p4 }
  0x21   : > { %6663 = sst [smem:[#allocation25_spill]] %s6662_s12  ;;  %s6641_s17 = sand.u32 1, %s5730_s26  }
  0x22   : > { %s6665_s1 = sld [smem:[#allocation26_spill]]  ;;  %s306_s28 = scalar_lea.vmem [#allocation6], %s5852_s14 }
  0x23   : > { %s316_s30 = sshll.u32 %s306_s28, 4  ;;  %s5877_s7 = scalar_lea.sflag [#allocation7], %s6641_s17  ;;  %s5872_s30 = int_to_ptr.vmem [resolvable:$true] %s316_s30 }
  0x24   : > { %p5883_p4 = pneg %p5859_p0 }
  0x28   : > { %s5868_s20 = scalar_lea.hbm %s6665_s1, %s5855_s15  ;;  %s5461_s29 = scalar_lea.hbm %s6665_s1, 512 }
  0x29   : > { %s5456_s8 = scalar_lea.hbm %s5868_s20, 256  ;;  %p5462_p7 = scmp.lt.u32.totalorder %s5868_s20, %s6665_s1 }
  0x2a   : > { %p5457_p3 = scmp.ne.s32.totalorder %s5868_s20, %s5456_s8  ;;  %p5463_p10 = scmp.lt.u32.totalorder %s5461_s29, %s5456_s8 }
  0x2b   : > { %p5465_p12 = scmp.lt.u32.totalorder %s5456_s8, %s5868_s20 }
  0x2c   : > { %p5459_p5 = pnand %p5883_p4, %p5457_p3  ;;  %p5464_p13 = por %p5463_p10, %p5462_p7 }
  0x2e   : > { %p5460_p6 = pneg %p5459_p5  ;;  %p5466_p1 = por %p5465_p12, %p5464_p13 }
  0x30   : > { %p5467_p2 = pnand %p5466_p1, %p5460_p6 }
  0x32   : > { %5470 = shalt.err (!%p5467_p2)
}
  0x33   : > { %s5471_s17 = scalar_lea.vmem %s5872_s30, 256  ;;  %s5732_s19 = smov [#allocation6]  }
  0x34   : > { %p5472_p3 = scmp.ne.s32.totalorder %s5872_s30, %s5471_s17  ;;  %s5476_s28 = sshll.u32 %s5732_s19, 4  ;;  %s5477_s28 = int_to_ptr.vmem [resolvable:$false] %s5476_s28 }
  0x35   : > { %s5478_s25 = scalar_lea.vmem %s5477_s28, 512  ;;  %p5479_p9 = scmp.lt.s32.totalorder %s5872_s30, %s5477_s28 }
  0x36   : > { %p5474_p5 = pnand %p5472_p3, %p5883_p4  ;;  %p5480_p8 = scmp.lt.s32.totalorder %s5478_s25, %s5471_s17 }
  0x38   : > { %p5475_p11 = pneg %p5474_p5  ;;  %p5481_p7 = por %p5480_p8, %p5479_p9 }
  0x3a   : > { %p5482_p10 = pnand %p5481_p7, %p5475_p11 }
  0x3c   : > { %5485 = shalt.err (!%p5482_p10)
}
  0x3d   : > { %s6644_s29 = smov 128   ;;  %s6646_s11 = smov 8  }
  0x3e   : > { %5331 = dma.hbm_to_vmem [thread:$0]  (!%p5859_p0), %s5868_s20, 256, %s5872_s30, %s5877_s7, %s6644_s29, %s6644_s29, %s6646_s11  }
  0x3f   : > { %p6667_p8 = scmp.lt.s32.totalorder %s5730_s26, 3  ;;  %p6668_p9 = scmp.ge.s32.totalorder %s5730_s26, 1 }
  0x40   : > { %s6670_s3 = sld [smem:[#allocation27_spill]]  ;;  %s354_s25 = scalar_lea.vmem [#allocation9], %s5852_s14 }
  0x41   : > { %p5914_p11 = pnand %p6668_p9, %p6667_p8  ;;  %s364_s1 = sshll.u32 %s354_s25, 4  ;;  %s5925_s1 = int_to_ptr.vmem [resolvable:$true] %s364_s1 }
  0x42   : > { %s6671_s20 = sand.u32 1, %s5730_s26  }
  0x43   : > { %s6669_s17 = scalar_select %p5914_p11, 1, 0 }
  0x44   : > { %s5929_s30 = scalar_lea.sflag [#allocation10], %s6671_s20 }
  0x46   : > { %s5922_s28 = scalar_lea.hbm %s6670_s3, %s5855_s15  ;;  %s5491_s19 = scalar_lea.hbm %s6670_s3, 512 }
  0x47   : > { %s5486_s29 = scalar_lea.hbm %s5922_s28, 256  ;;  %p5492_p6 = scmp.lt.u32.totalorder %s5922_s28, %s6670_s3 }
  0x48   : > { %p5487_p12 = scmp.ne.s32.totalorder %s5922_s28, %s5486_s29  ;;  %p5493_p13 = scmp.lt.u32.totalorder %s5491_s19, %s5486_s29 }
  0x49   : > { %p5495_p5 = scmp.lt.u32.totalorder %s5486_s29, %s5922_s28 }
  0x4a   : > { %p5489_p1 = pnand %p5487_p12, %p5883_p4  ;;  %p5494_p3 = por %p5493_p13, %p5492_p6 }
  0x4c   : > { %p5490_p2 = pneg %p5489_p1  ;;  %p5496_p7 = por %p5495_p5, %p5494_p3 }
  0x4e   : > { %p5497_p10 = pnand %p5496_p7, %p5490_p2 }
  0x50   : > { %5500 = shalt.err (!%p5497_p10)
}
  0x51   : > { %s5501_s25 = scalar_lea.vmem %s5925_s1, 256  ;;  %s5735_s11 = smov [#allocation9]  }
  0x52   : > { %p5502_p8 = scmp.ne.s32.totalorder %s5925_s1, %s5501_s25  ;;  %s5506_s20 = sshll.u32 %s5735_s11, 4  ;;  %s5507_s20 = int_to_ptr.vmem [resolvable:$false] %s5506_s20 }
  0x53   : > { %s5508_s23 = scalar_lea.vmem %s5507_s20, 512  ;;  %p5509_p1 = scmp.lt.s32.totalorder %s5925_s1, %s5507_s20 }
  0x54   : > { %p5504_p9 = pnand %p5502_p8, %p5883_p4  ;;  %p5510_p11 = scmp.lt.s32.totalorder %s5508_s23, %s5501_s25 }
  0x56   : > { %p5505_p12 = pneg %p5504_p9  ;;  %p5511_p6 = por %p5510_p11, %p5509_p1 }
  0x58   : > { %p5512_p13 = pnand %p5511_p6, %p5505_p12 }
  0x5a   : > { %5515 = shalt.err (!%p5512_p13)
}
  0x5b   : > { %s6672_s12 = smov 8   ;;  %s6673_s29 = smov 128  }
  0x5c   : > { %5337 = dma.hbm_to_vmem [thread:$0]  (!%p5859_p0), %s5922_s28, 256, %s5925_s1, %s5929_s30, %s6673_s29, %s6673_s29, %s6672_s12  }
  0x5d   : > { %s5960_s25 = scalar_lea.hbm %s6632_s0, %s5855_s15  ;;  %s282_s11 = scalar_lea.vmem [#allocation3], %s5852_s14 }
  0x5e   : > { %s292_s20 = sshll.u32 %s282_s11, 4  ;;  %s279_s23 = scalar_lea.sflag [#allocation4], %s5849_s13  ;;  %s5963_s20 = int_to_ptr.vmem [resolvable:$true] %s292_s20 }
  0x5f   : > { %s5516_s3 = scalar_lea.hbm %s5960_s25, 256  ;;  %s5521_s8 = scalar_lea.hbm %s6632_s0, 512 }
  0x60   : > { %p5517_p11 = scmp.ne.s32.totalorder %s5960_s25, %s5516_s3  ;;  %p5522_p5 = scmp.lt.u32.totalorder %s5960_s25, %s6632_s0 }
  0x61   : > { %p5523_p7 = scmp.lt.u32.totalorder %s5521_s8, %s5516_s3  ;;  %p5525_p8 = scmp.lt.u32.totalorder %s5516_s3, %s5960_s25 }
  0x62   : > { %p5519_p2 = pnand %p5517_p11, %p5883_p4 }
  0x63   : > { %p5524_p10 = por %p5523_p7, %p5522_p5 }
  0x64   : > { %p5520_p3 = pneg %p5519_p2 }
  0x65   : > { %p5526_p9 = por %p5525_p8, %p5524_p10 }
  0x67   : > { %p5527_p12 = pnand %p5526_p9, %p5520_p3 }
  0x69   : > { %5530 = shalt.err (!%p5527_p12)
}
  0x6a   : > { %s5531_s11 = scalar_lea.vmem %s5963_s20, 256  ;;  %s5736_s1 = smov [#allocation3]  }
  0x6b   : > { %p5532_p1 = scmp.ne.s32.totalorder %s5963_s20, %s5531_s11  ;;  %s5536_s28 = sshll.u32 %s5736_s1, 4  ;;  %s5537_s28 = int_to_ptr.vmem [resolvable:$false] %s5536_s28 }
  0x6c   : > { %s5538_s26 = scalar_lea.vmem %s5537_s28, 512  ;;  %p5539_p11 = scmp.lt.s32.totalorder %s5963_s20, %s5537_s28 }
  0x6d   : > { %p5534_p6 = pnand %p5532_p1, %p5883_p4  ;;  %p5540_p2 = scmp.lt.s32.totalorder %s5538_s26, %s5531_s11 }
  0x6f   : > { %p5535_p13 = pneg %p5534_p6  ;;  %p5541_p5 = por %p5540_p2, %p5539_p11 }
  0x71   : > { %p5542_p7 = pnand %p5541_p5, %p5535_p13 }
  0x73   : > { %5545 = shalt.err (!%p5542_p7)
}
  0x74   : > { %5328 = dma.hbm_to_vmem [thread:$0]  (!%p5859_p0), %s5960_s25, 256, %s5963_s20, %s279_s23, %s6673_s29, %s6673_s29, %s6672_s12  }
  0x75   : > { %s5996_s19 = scalar_lea.hbm %s6634_s2, %s5855_s15  ;;  %s330_s11 = scalar_lea.vmem [#allocation8], %s5852_s14 }
  0x76   : > { %s340_s1 = sshll.u32 %s330_s11, 4  ;;  %s5546_s28 = scalar_lea.hbm %s5996_s19, 256  ;;  %s5999_s1 = int_to_ptr.vmem [resolvable:$true] %s340_s1 }
  0x77   : > { %p5547_p3 = scmp.ne.s32.totalorder %s5996_s19, %s5546_s28  ;;  %s5551_s20 = scalar_lea.hbm %s6634_s2, 512 }
  0x78   : > { %p5552_p9 = scmp.lt.u32.totalorder %s5996_s19, %s6634_s2  ;;  %p5553_p12 = scmp.lt.u32.totalorder %s5551_s20, %s5546_s28 }
  0x79   : > { %p5549_p10 = pnand %p5547_p3, %p5883_p4  ;;  %p5555_p6 = scmp.lt.u32.totalorder %s5546_s28, %s5996_s19 }
  0x7a   : > { %p5554_p1 = por %p5553_p12, %p5552_p9 }
  0x7b   : > { %p5550_p8 = pneg %p5549_p10 }
  0x7c   : > { %p5556_p13 = por %p5555_p6, %p5554_p1 }
  0x7e   : > { %p5557_p11 = pnand %p5556_p13, %p5550_p8 }
  0x80   : > { %5560 = shalt.err (!%p5557_p11)
}
  0x81   : > { %s5561_s8 = scalar_lea.vmem %s5999_s1, 256  ;;  %s5737_s11 = smov [#allocation8]  }
  0x82   : > { %p5562_p2 = scmp.ne.s32.totalorder %s5999_s1, %s5561_s8  ;;  %s5566_s26 = sshll.u32 %s5737_s11, 4  ;;  %s5567_s26 = int_to_ptr.vmem [resolvable:$false] %s5566_s26 }
  0x83   : > { %s5568_s25 = scalar_lea.vmem %s5567_s26, 512  ;;  %p5569_p3 = scmp.lt.s32.totalorder %s5999_s1, %s5567_s26 }
  0x84   : > { %p5564_p5 = pnand %p5562_p2, %p5883_p4  ;;  %p5570_p10 = scmp.lt.s32.totalorder %s5568_s25, %s5561_s8 }
  0x86   : > { %p5565_p7 = pneg %p5564_p5  ;;  %p5571_p9 = por %p5570_p10, %p5569_p3 }
  0x88   : > { %p5572_p12 = pnand %p5571_p9, %p5565_p7 }
  0x8a   : > { %5575 = shalt.err (!%p5572_p12)
}
  0x8b   : > { %5334 = dma.hbm_to_vmem [thread:$0]  (!%p5859_p0), %s5996_s19, 256, %s5999_s1, %s5877_s7, %s6673_s29, %s6673_s29, %s6672_s12  }
  0x8c   : > { %s6030_s23 = scalar_lea.hbm %s6636_s4, %s5855_s15  ;;  %s378_s3 = scalar_lea.vmem [#allocation11], %s5852_s14 }
  0x8d   : > { %s388_s8 = sshll.u32 %s378_s3, 4  ;;  %s5576_s11 = scalar_lea.hbm %s6030_s23, 256  ;;  %s6033_s8 = int_to_ptr.vmem [resolvable:$true] %s388_s8 }
  0x8e   : > { %p5577_p8 = scmp.ne.s32.totalorder %s6030_s23, %s5576_s11  ;;  %s5581_s19 = scalar_lea.hbm %s6636_s4, 512 }
  0x8f   : > { %p5582_p13 = scmp.lt.u32.totalorder %s6030_s23, %s6636_s4  ;;  %p5583_p11 = scmp.lt.u32.totalorder %s5581_s19, %s5576_s11 }
  0x90   : > { %p5579_p1 = pnand %p5577_p8, %p5883_p4  ;;  %p5585_p5 = scmp.lt.u32.totalorder %s5576_s11, %s6030_s23 }
  0x91   : > { %p5584_p2 = por %p5583_p11, %p5582_p13 }
  0x92   : > { %p5580_p6 = pneg %p5579_p1 }
  0x93   : > { %p5586_p7 = por %p5585_p5, %p5584_p2 }
  0x95   : > { %p5587_p3 = pnand %p5586_p7, %p5580_p6 }
  0x97   : > { %5590 = shalt.err (!%p5587_p3)
}
  0x98   : > { %s5591_s28 = scalar_lea.vmem %s6033_s8, 256  ;;  %s5738_s20 = smov [#allocation11]  }
  0x99   : > { %p5592_p10 = scmp.ne.s32.totalorder %s6033_s8, %s5591_s28  ;;  %s5596_s3 = sshll.u32 %s5738_s20, 4  ;;  %s5597_s3 = int_to_ptr.vmem [resolvable:$false] %s5596_s3 }
  0x9a   : > { %s5598_s26 = scalar_lea.vmem %s5597_s3, 512  ;;  %p5599_p8 = scmp.lt.s32.totalorder %s6033_s8, %s5597_s3 }
  0x9b   : > { %p5594_p9 = pnand %p5592_p10, %p5883_p4  ;;  %p5600_p1 = scmp.lt.s32.totalorder %s5598_s26, %s5591_s28 }
  0x9d   : > { %p5595_p12 = pneg %p5594_p9  ;;  %p5601_p13 = por %p5600_p1, %p5599_p8 }
  0x9f   : > { %p5602_p11 = pnand %p5601_p13, %p5595_p12 }
  0xa1   : > { %5605 = shalt.err (!%p5602_p11)
}
  0xa2   : > { %5340 = dma.hbm_to_vmem [thread:$0]  (!%p5859_p0), %s6030_s23, 256, %s6033_s8, %s5929_s30, %s6673_s29, %s6673_s29, %s6672_s12  }
  0xa3   : > { %s6064_s19 = scalar_lea.hbm %s6637_s5, %s5855_s15  ;;  %s402_s1 = scalar_lea.vmem [#allocation12], %s5852_s14 }
  0xa4   : > { %s412_s25 = sshll.u32 %s402_s1, 4  ;;  %s399_s28 = scalar_lea.sflag [#allocation13], %s5849_s13  ;;  %s6067_s25 = int_to_ptr.vmem [resolvable:$true] %s412_s25 }
  0xa5   : > { %s5606_s20 = scalar_lea.hbm %s6064_s19, 256  ;;  %s5611_s8 = scalar_lea.hbm %s6637_s5, 512 }
  0xa6   : > { %p5607_p6 = scmp.ne.s32.totalorder %s6064_s19, %s5606_s20  ;;  %p5612_p7 = scmp.lt.u32.totalorder %s6064_s19, %s6637_s5 }
  0xa7   : > { %p5613_p3 = scmp.lt.u32.totalorder %s5611_s8, %s5606_s20  ;;  %p5615_p9 = scmp.lt.u32.totalorder %s5606_s20, %s6064_s19 }
  0xa8   : > { %p5609_p2 = pnand %p5607_p6, %p5883_p4 }
  0xa9   : > { %p5614_p10 = por %p5613_p3, %p5612_p7 }
  0xaa   : > { %p5610_p5 = pneg %p5609_p2 }
  0xab   : > { %p5616_p12 = por %p5615_p9, %p5614_p10 }
  0xad   : > { %p5617_p8 = pnand %p5616_p12, %p5610_p5 }
  0xaf   : > { %5620 = shalt.err (!%p5617_p8)
}
  0xb0   : > { %s5621_s14 = scalar_lea.vmem %s6067_s25, 256  ;;  %s5739_s26 = smov [#allocation12]  }
  0xb1   : > { %p5622_p1 = scmp.ne.s32.totalorder %s6067_s25, %s5621_s14  ;;  %s5626_s11 = sshll.u32 %s5739_s26, 4  ;;  %s5627_s11 = int_to_ptr.vmem [resolvable:$false] %s5626_s11 }
  0xb2   : > { %s5628_s7 = scalar_lea.vmem %s5627_s11, 512  ;;  %p5629_p6 = scmp.lt.s32.totalorder %s6067_s25, %s5627_s11 }
  0xb3   : > { %p5624_p13 = pnand %p5622_p1, %p5883_p4  ;;  %p5630_p2 = scmp.lt.s32.totalorder %s5628_s7, %s5621_s14 }
  0xb5   : > { %p5625_p11 = pneg %p5624_p13  ;;  %p5631_p7 = por %p5630_p2, %p5629_p6 }
  0xb7   : > { %p5632_p3 = pnand %p5631_p7, %p5625_p11 }
  0xb9   : > { %5635 = shalt.err (!%p5632_p3)
}
  0xba   : > { %5343 = dma.hbm_to_vmem [thread:$0]  (!%p5859_p0), %s6064_s19, 256, %s6067_s25, %s399_s28, %s6673_s29, %s6673_s29, %s6672_s12  }
  0xbb   : > { %p6674_p4 = scmp.ne.s32.totalorder %s6669_s17, 0 }
  0xbc   : > { %s6099_s18 = sand.u32 (!%p6674_p4), 1, %s5714_s22   ;;  %p6675_p5 = scmp.ne.s32.totalorder (!%p6674_p4), %s6659_s9, 0 }
  0xbd   : > { %424 = sbr.rel (%p6674_p4) target bundleno = 3385 (0xd39), region = 44  ;;  %s6102_s1 = sshll.u32 (!%p6674_p4), %s6099_s18, 4 }
  0xbe   : > { %s427_s16 = scalar_lea.sflag (!%p6674_p4), [#allocation4], %s6099_s18  ;;  %s430_s20 = scalar_lea.vmem (!%p6674_p4), [#allocation3], %s6102_s1 }
  0xc4   : > { %5689 = dma.done.wait (%p6675_p5), %s427_s16, 256  }
  0xc5   : > { %5691 = vsyncadd (%p6675_p5), %s427_s16, 4294967040  ;;  %s435_s13 = sand.u32 1, %s5811_s27   ;;  %s439_s12 = scalar_lea.vmem [#allocation6], %s6102_s1 }
  0xc6   : > { %s436_s17 = scalar_lea.sflag [#allocation7], %s435_s13 }
  0xc7   : > { %5693 = dma.done.wait (%p6675_p5), %s436_s17, 512  }
  0xc8   : > { %5695 = vsyncadd (%p6675_p5), %s436_s17, 4294966784  ;;  %s448_s29 = scalar_lea.vmem [#allocation8], %s6102_s1  ;;  %s454_s19 = scalar_lea.sflag [#allocation10], %s435_s13 }
  0xc9   : > { %s457_s25 = scalar_lea.vmem [#allocation9], %s6102_s1 }
  0xca   : > { %5697 = dma.done.wait (%p6675_p5), %s454_s19, 512  }
  0xcb   : > { %5699 = vsyncadd (%p6675_p5), %s454_s19, 4294966784  ;;  %s466_s27 = scalar_lea.vmem [#allocation11], %s6102_s1  ;;  %s472_s28 = scalar_lea.sflag [#allocation13], %s6099_s18 }
  0xcc   : > { %s475_s30 = scalar_lea.vmem [#allocation12], %s6102_s1 }
  0xcd   : > { %5701 = dma.done.wait (%p6675_p5), %s472_s28, 256  }
  0xce   : > { %5703 = vsyncadd (%p6675_p5), %s472_s28, 4294967040  ;;  %v548_v0 = vlaneseq  ;;  %vm573_vm0 = vcmask 130048   ;;  %v5740_v4 = vmov 0.0   ;;  %v571_v6 = vld [vmem:[%s430_s20] sm:$0xff]  ;;  %v572_v7 = vld [vmem:[%s430_s20 + $0x8] sm:$0xff]  ;;  %vm697_vm3 = vcmask 523264  }
  0xcf   : > { %v5103_v8 = vpack.c.bf16 %v572_v7, %v571_v6  ;;  %v684_v24 = vld [vmem:[%s475_s30 + $0x8] sm:$0xff]  ;;  %v665_v26 = vld [vmem:[%s466_s27] sm:$0xff]  ;;  %s5741_s9 = smov 64   ;;  %vm6171_vm4 = vmpackc.low %vm697_vm3, %vm697_vm3  ;;  %s528_s23 = scalar_lea.vmem [#allocation14], %s6102_s1 }
  0xd0   : > { %v6129_v1 = vshrl.u32 %v548_v0, 7  ;;  %v6131_v2 = vand.u32 127, %v548_v0  ;;  %v680_v25 = vld [vmem:[%s448_s29 + $0x8] sm:$0xff]  ;;  %v683_v28 = vld [vmem:[%s475_s30] sm:$0xff]  ;;  %s4191_s8 = sshll.u32 %s528_s23, 4  ;;  %s4605_s15 = sshll.u32 %s5722_s24, 8  ;;  %s6574_s8 = int_to_ptr.vmem [resolvable:$true] %s4191_s8 }
  0xd1   : > { %5104 = vmatprep.subr.bf16.mxu1 %v5103_v8  ;;  %v679_v29 = vld [vmem:[%s448_s29] sm:$0xff]  ;;  %v666_v42 = vld [vmem:[%s466_s27 + $0x8] sm:$0xff]  ;;  %s6579_s26 = scalar_lea.hbm %s6638_s6, %s4605_s15  ;;  %s4175_s24 = scalar_lea.sflag [#allocation5], %s6099_s18 }
  0xd2   : > { %vm553_vm1 = vcmp.le.s32.totalorder %v6131_v2, %v6129_v1  ;;  %v6136_v3 = vadd.s32 8, %v6129_v1  ;;  %5106 = vmatpush3.bf16.msra.mxu1 %v5103_v8  ;;  %v2026_v22 = vsub.s32 7, %v6129_v1  ;;  %v659_v54 = vld [vmem:[%s439_s12] sm:$0xff]  ;;  %v660_v57 = vld [vmem:[%s439_s12 + $0x8] sm:$0xff]  ;;  %vm559_vm6 = vcmp.lt.s32.totalorder %v6131_v2, %v6129_v1  ;;  %s5636_s11 = scalar_lea.vmem %s6574_s8, 256  ;;  %p6678_p10 = scmp.ne.s32.totalorder %s6660_s10, 0 }
  0xd3   : > { %v6139_v5 = vsel %vm553_vm1, 1.0, %v5740_v4  ;;  %v6237_v59 = vld [vmem:[%s457_s25] sm:$0xff]  ;;  %v6242_v60 = vld [vmem:[%s457_s25 + $0x8] sm:$0xff]  ;;  %vm565_vm7 = vcmp.eq.s32.totalorder %v6131_v2, %v6129_v1  ;;  %p5637_p0 = scmp.ne.s32.totalorder %s6574_s8, %s5636_s11  ;;  %s5742_s7 = smov [#allocation14]  }
  0xd4   : > { %4792 = vmatprep.mubr.msk.f32.mxu1 %vm573_vm0, %v6139_v5  ;;  %vm554_vm2 = vcmp.le.s32.totalorder %v6131_v2, %v6136_v3  ;;  %vm560_vm5 = vcmp.lt.s32.totalorder %v6131_v2, %v6136_v3  ;;  %vm566_vm8 = vcmp.eq.s32.totalorder %v6131_v2, %v6136_v3  ;;  %s5640_s1 = sshll.u32 %s5742_s7, 4  ;;  %s5641_s1 = int_to_ptr.vmem [resolvable:$false] %s5640_s1 }
  0xd5   : > { %v6146_v9 = vsel %vm554_vm2, 1.0, %v5740_v4  ;;  %p5638_p9 = pnand %p5637_p0, %p6678_p10  ;;  %s5642_s16 = scalar_lea.vmem %s5641_s1, 512 }
  0xd6   : > { %4793 = vmatmul.mubr.msk.f32.vlgmr.msra.gmra.mrb[0].mxu1 %vm573_vm0, %v6146_v9  ;;  %p5643_p8 = scmp.lt.s32.totalorder %s6574_s8, %s5641_s1  ;;  %p5644_p1 = scmp.lt.s32.totalorder %s5642_s16, %s5636_s11 }
  0xd7   : > { %p5639_p12 = pneg %p5638_p9 }
  0xd8   : > { %p5645_p13 = por %p5644_p1, %p5643_p8 }
  0xda   : > { %p5646_p11 = pnand %p5645_p13, %p5639_p12 }
 0x1a9   : > { %v4794_v10 = vpop.f32.mrb[0].mxu1 }
 0x1aa   : > { %v657_v11 = vmul.f32 1.442695, %v4794_v10  ;;  %v674_v12 = vsub.f32 0.0, %v4794_v10  ;;  %v646_v13 = vpop.f32.mrb[1].mxu1  ;;  %v656_v14 = vsub.f32 %v4794_v10, %v572_v7 }
 0x1ab   : > { %v655_v15 = vsub.f32 %v646_v13, %v571_v6  ;;  %v673_v16 = vsub.f32 0.0, %v646_v13  ;;  %v661_v21 = vmul.f32 1.442695, %v646_v13 }
 0x1ac   : > { %v677_v17 = vmul.f32 1.442695, %v674_v12  ;;  %5444 = vpow2.f32 %v657_v11  ;;  %v669_v20 = vmul.f32 1.442695, %v656_v14  ;;  %v6281_v14 = vsel %vm560_vm5, 1.0, %v5740_v4 }
 0x1ad   : > { %v667_v18 = vmul.f32 1.442695, %v655_v15  ;;  %v675_v19 = vmul.f32 1.442695, %v673_v16  ;;  %v6286_v15 = vsel %vm559_vm6, 1.0, %v5740_v4 }
 0x1ae   : > { %5446 = vpow2.f32 %v677_v17 }
 0x1af   : > { %5448 = vpow2.f32 %v667_v18 }
 0x1b0   : > { %5450 = vpow2.f32 %v675_v19  ;;  %v6291_v19 = vsel %vm565_vm7, 1.0, %v5740_v4 }
 0x1b1   : > { %5452 = vpow2.f32 %v669_v20 }
 0x1b2   : > { %5454 = vpow2.f32 %v661_v21 }
 0x1b6   : > { %v5445_v23 = vpop.eup %5444 }
 0x1b7   : > { %v2027_v33 = vrot.slane %v5445_v23, %v2026_v22  ;;  %v6221_v58 = vmul.f32 %v5445_v23, %v660_v57 }
 0x1b8   : > { %v5447_v27 = vpop.eup %5446 }
 0x1b9   : > { %v5449_v30 = vpop.eup %5448  ;;  %v686_v31 = vmul.f32 %v5447_v27, %v684_v24  ;;  %v682_v32 = vmul.f32 %v5447_v27, %v680_v25 }
 0x1ba   : > { %v5451_v34 = vpop.eup %5450  ;;  %v6161_v35 = vmul.f32 %v5449_v30, %v665_v26 }
 0x1bb   : > { %v685_v36 = vmul.f32 %v5451_v34, %v683_v28  ;;  %v681_v37 = vmul.f32 %v5451_v34, %v679_v29  ;;  %v2029_v38 = vmul.f32 %v2027_v33, %v682_v32  ;;  %v6163_v39 = vmul.f32 %v2027_v33, %v686_v31  ;;  %v5453_v40 = vpop.eup %5452 }
 0x1bc   : > { %2378 = vrot.lane.b32.xlu1 %v6161_v35, %s5741_s9  ;;  %4799 = vmatprep.mubr.msk.f32.mxu1 %vm697_vm3, %v6161_v35  ;;  %v6184_v49 = vmul.f32 %v5453_v40, %v666_v42  ;;  %v5455_v53 = vpop.eup %5454 }
 0x1bd   : > { %4806 = vmatprep.mubr.msk.f32.mxu0 %vm697_vm3, %v6161_v35  ;;  %v5113_v43 = vpack.c.bf16 %v686_v31, %v685_v36  ;;  %v5404_v44 = vpack.i.bf16 %v682_v32, %v681_v37  ;;  %v5107_v45 = vpack.c.bf16 %v682_v32, %v681_v37  ;;  %v5409_v46 = vpack.i.bf16 %v686_v31, %v685_v36 }
 0x1be   : > { %v2028_v47 = vmul.f32 %v2027_v33, %v681_v37  ;;  %v6179_v48 = vmul.f32 %v2027_v33, %v685_v36  ;;  %v6209_v56 = vmul.f32 %v5455_v53, %v659_v54  ;;  %v6310_v31 = vsel %vm566_vm8, 1.0, %v5740_v4 }
 0x1bf   : > { %5115 = vmatprep.subr.msk.bf16.mxu0 %vm6171_vm4, %v5113_v43  ;;  %5405 = vrot.lane.b32.xlu0 %v5404_v44, %s5741_s9 }
 0x1c0   : > { %5109 = vmatprep.subr.msk.bf16.mxu1 %vm6171_vm4, %v5107_v45  ;;  %5118 = vmatpush3.bf16.xpose.msk.msra.mxu0 %vm6171_vm4, %v5113_v43  ;;  %v5434_v50 = vpack.i.bf16 %v2029_v38, %v2028_v47  ;;  %v6190_v51 = vpack.c.bf16 %v2029_v38, %v2028_v47  ;;  %v6194_v52 = vpack.c.bf16 %v6163_v39, %v6179_v48 }
 0x1c1   : > { %5112 = vmatpush3.bf16.xpose.msk.msra.mxu1 %vm6171_vm4, %v5107_v45  ;;  %5127 = vmatprep.subr.msk.bf16.mxu0 %vm6171_vm4, %v5113_v43  ;;  %v5439_v55 = vpack.i.bf16 %v6163_v39, %v6179_v48  ;;  %v6318_v38 = vpack.c.bf16 %v6242_v60, %v6237_v59 }
 0x1c2   : > { %5121 = vmatprep.subr.msk.bf16.mxu1 %vm6171_vm4, %v5107_v45  ;;  %2380 = vrot.lane.b32.xlu1 %v6184_v49, %s5741_s9 }
 0x1c3   : > { %5410 = vrot.lane.b32.xlu0 %v5409_v46, %s5741_s9 }
 0x1c6   : > { %2556 = vrot.lane.b32.xlu1 %v6209_v56, %s5741_s9 }
 0x1c7   : > { %4807 = vmatmul.mubr.msk.f32.vlgmr.msra.gmra.mrb[0].mxu0 %vm697_vm3, %v6184_v49 }
 0x1c8   : > { %4800 = vmatmul.mubr.msk.f32.vlgmr.msra.gmra.mrb[2].mxu1 %vm697_vm3, %v6184_v49  ;;  %5130 = vmatpush3.bf16.xpose.msk.msra.mxu0 %vm6171_vm4, %v5113_v43 }
 0x1c9   : > { %5124 = vmatpush3.bf16.xpose.msk.msra.mxu1 %vm6171_vm4, %v5107_v45  ;;  %4813 = vmatprep.mubr.msk.f32.mxu1 %vm697_vm3, %v6209_v56 }
 0x1ca   : > { %4820 = vmatprep.mubr.msk.f32.mxu0 %vm697_vm3, %v6209_v56  ;;  %2558 = vrot.lane.b32.xlu1 %v6221_v58, %s5741_s9 }
 0x1cf   : > { %4821 = vmatmul.mubr.msk.f32.vlgmr.msra.gmra.mrb[2].mxu0 %vm697_vm3, %v6221_v58 }
 0x1d0   : > { %4814 = vmatmul.mubr.msk.f32.vlgmr.msra.gmra.mrb[4].mxu1 %vm697_vm3, %v6221_v58 }
 0x1e1   : > { %2032 = vxpose.xlu0.b32.start [1/2] (short) (narrow) %v6237_v59, 64 }
 0x1e5   : > { %2033 = vxpose.xlu0.b32.end [2/2] (short) (narrow) %v6242_v60, 64 }
 0x226   : > { %3214 = vrot.lane.b32.xlu0 %v6237_v59, %s5741_s9 }
 0x22a   : > { %5415 = vrot.lane.b32.xlu0 %v5740_v4, %s5741_s9 }
 0x22e   : > { %5420 = vrot.lane.b32.xlu0 %v5740_v4, %s5741_s9 }
 0x231   : > { %v6254_v61 = vpop.permute.xlu0 %5405 }
 0x232   : > { %5425 = vrot.lane.b32.xlu0 %v5740_v4, %s5741_s9  ;;  %v5408_v44 = vunpack.i.h.bf16 %v6254_v61  ;;  %v5407_v45 = vunpack.i.l.bf16 %v6254_v61 }
 0x234   : > { %v6338_v46 = vpack.c.bf16 %v5408_v44, %v5407_v45 }
 0x235   : > { %v6256_v62 = vpop.permute.xlu0 %5410 }
 0x236   : > { %5435 = vrot.lane.b32.xlu0 %v5434_v50, %s5741_s9  ;;  %v5412_v47 = vunpack.i.l.bf16 %v6256_v62  ;;  %v6365_v50 = vpop.permute.xlu1 %2378 }
 0x261   : > { %v6258_v63 = vpop.trf.xlu0 }
 0x265   : > { %v6260_v0 = vpop.trf.xlu0 }
 0x269   : > { %v6262_v6 = vpop.trf.xlu0 }
 0x26d   : > { %v6264_v7 = vpop.trf.xlu0 }
 0x271   : > { %v6266_v8 = vpop.trf.xlu0 }
 0x275   : > { %v6268_v10 = vpop.trf.xlu0 }
 0x279   : > { %v6270_v11 = vpop.trf.xlu0 }
 0x27d   : > { %v6272_v12 = vpop.trf.xlu0 }
 0x298   : > { %v6278_v13 = vpop.permute.xlu0 %3214 }
 0x299   : > { %3728 = vxpose.xlu0.b32.start [1/2] (short) (narrow) %v6278_v13, 64 }
 0x29a   : > { %v4808_v16 = vpop.f32.mrb[0].mxu0 }
 0x29b   : > { %v4801_v17 = vpop.f32.mrb[2].mxu1  ;;  %v869_v18 = vmul.f32 %v4808_v16, %v6281_v14  ;;  %v859_v20 = vpop.f32.mrb[1].mxu0 }
 0x29c   : > { %v776_v21 = vpop.f32.mrb[3].mxu1  ;;  %v868_v22 = vmul.f32 %v6286_v15, %v859_v20  ;;  %v786_v43 = vmul.f32 %v4801_v17, %v6281_v14 }
 0x29d   : > { %v1031_v32 = vadd.f32 %v6310_v31, %v869_v18  ;;  %v785_v42 = vmul.f32 %v6286_v15, %v776_v21 }
 0x29e   : > { %v1030_v23 = vadd.f32 %v6291_v19, %v868_v22  ;;  %4827 = vmatprep.mubr.msk.f32.mxu1 %vm573_vm0, %v868_v22  ;;  %v5131_v1 = vpack.c.bf16 %v869_v18, %v868_v22 }
 0x2a0   : > { %5132 = vmatprep.subr.bf16.mxu1 %v5131_v1  ;;  %4834 = vmatprep.mubr.msk.f32.mxu0 %vm573_vm0, %v1030_v23 }
 0x2a1   : > { %5134 = vmatpush3.bf16.msra.mxu1 %v5131_v1 }
 0x2a2   : > { %v6297_v24 = vpop.f32.mrb[2].mxu0 }
 0x2a3   : > { %v6299_v25 = vpop.f32.mrb[4].mxu1  ;;  %v6301_v26 = vpop.f32.mrb[3].mxu0 }
 0x2a4   : > { %v6303_v27 = vpop.f32.mrb[5].mxu1  ;;  %4828 = vmatmul.mubr.msk.f32.vlgmr.msra.gmra.mrb[6].mxu1 %vm573_vm0, %v869_v18 }
 0x377   : > { %v4829_v28 = vpop.f32.mrb[6].mxu1 }
 0x378   : > { %v1104_v29 = vpop.f32.mrb[7].mxu1 }
 0x379   : > { %v5135_v30 = vpack.c.bf16 %v4829_v28, %v1104_v29  ;;  %4841 = vmatprep.mubr.msk.f32.mxu1 %vm573_vm0, %v1104_v29 }
 0x37b   : > { %5136 = vmatprep.subr.bf16.mxu0 %v5135_v30  ;;  %5140 = vmatprep.subr.bf16.mxu1 %v5135_v30 }
 0x37c   : > { %5138 = vmatpush3.bf16.msra.mxu0 %v5135_v30  ;;  %5142 = vmatpush3.bf16.msra.mxu1 %v5135_v30 }
 0x37f   : > { %4835 = vmatmul.mubr.msk.f32.vlgmr.msra.gmra.mrb[4].mxu0 %vm573_vm0, %v1031_v32  ;;  %4842 = vmatmul.mubr.msk.f32.vlgmr.msra.gmra.mrb[8].mxu1 %vm573_vm0, %v4829_v28 }
 0x452   : > { %v4836_v33 = vpop.f32.mrb[4].mxu0  ;;  %v4843_v2 = vpop.f32.mrb[8].mxu1 }
 0x453   : > { %v1185_v3 = vpop.f32.mrb[5].mxu0  ;;  %v1268_v34 = vpop.f32.mrb[9].mxu1  ;;  %v1195_v40 = vadd.f32 %v4836_v33, %v1031_v32 }
 0x454   : > { %v1194_v36 = vadd.f32 %v1185_v3, %v1030_v23  ;;  %v5143_v37 = vpack.c.bf16 %v4843_v2, %v1268_v34  ;;  %4855 = vmatprep.mubr.msk.f32.mxu1 %vm573_vm0, %v1268_v34 }
 0x456   : > { %5144 = vmatprep.subr.bf16.mxu0 %v5143_v37  ;;  %4848 = vmatprep.mubr.msk.f32.mxu0 %vm573_vm0, %v1194_v36 }
 0x457   : > { %5148 = vmatprep.subr.bf16.mxu1 %v5143_v37  ;;  %5146 = vmatpush3.bf16.msra.mxu0 %v5143_v37 }
 0x458   : > { %5150 = vmatpush3.bf16.msra.mxu1 %v5143_v37  ;;  %v952_v37 = vmul.f32 %v6299_v25, %v6146_v9 }
 0x459   : > { %5156 = vmatprep.subr.bf16.mxu1 %v6318_v38 }
 0x45a   : > { %4849 = vmatmul.mubr.msk.f32.vlgmr.msra.gmra.mrb[6].mxu0 %vm573_vm0, %v1195_v40 }
 0x45b   : > { %4856 = vmatmul.mubr.msk.f32.vlgmr.msra.gmra.mrb[10].mxu1 %vm573_vm0, %v4843_v2 }
 0x45c   : > { %5158 = vmatpush3.bf16.msra.mxu1 %v6318_v38  ;;  %4869 = vmatprep.mubr.msk.f32.mxu1 %vm573_vm0, %v785_v42 }
 0x45d   : > { %4872 = vmatprep.subr.msk.mxu1 %vm697_vm3, %v5740_v4 }
 0x45f   : > { %4870 = vmatmul.mubr.msk.f32.vlgmr.msra.gmra.mrb[12].mxu1 %vm573_vm0, %v786_v43 }
 0x460   : > { %4874 = vmatprep.mubr.msk.f32.mxu1 %vm697_vm3, %v6161_v35  ;;  %v5413_v35 = vunpack.i.h.bf16 %v6256_v62 }
 0x465   : > { %4873 = vmatpush3.xpose.msk.msra.mxu1 %vm697_vm3, %v5740_v4 }
 0x466   : > { %5172 = vmatprep.subr.bf16.mxu1 %v6190_v51 }
 0x468   : > { %4875 = vmatmul.mubr.msk.f32.vlgmr.msra.gmra.mrb[12].mxu1 %vm697_vm3, %v6184_v49  ;;  %v5185_v49 = vpack.c.bf16 %v5413_v35, %v5412_v47 }
 0x469   : > { %5174 = vmatpush3.bf16.msra.mxu1 %v6190_v51  ;;  %4907 = vmatprep.mubr.msk.f32.mxu1 %vm573_vm0, %v6258_v63  ;;  %v6373_v51 = vpop.permute.xlu1 %2380 }
 0x46a   : > { %5181 = vmatprep.subr.msk.bf16.mxu1 %vm6171_vm4, %v6338_v46 }
 0x46c   : > { %4908 = vmatmul.mubr.msk.f32.vlgmr.msra.gmra.mrb[14].mxu1 %vm573_vm0, %v6260_v0 }
 0x46d   : > { %4910 = vmatprep.mubr.msk.f32.mxu1 %vm573_vm0, %v6262_v6  ;;  %v6383_v53 = vpop.permute.xlu1 %2556 }
 0x470   : > { %4911 = vmatmul.mubr.msk.f32.gmra.mrb[16].mxu1 %vm573_vm0, %v6264_v7 }
 0x471   : > { %4913 = vmatprep.mubr.msk.f32.mxu1 %vm573_vm0, %v6266_v8  ;;  %v6391_v54 = vpop.permute.xlu1 %2558 }
 0x472   : > { %5184 = vmatpush3.bf16.xpose.msk.msra.mxu1 %vm6171_vm4, %v6338_v46 }
 0x473   : > { %5187 = vmatprep.subr.msk.bf16.mxu1 %vm6171_vm4, %v5185_v49 }
 0x474   : > { %4914 = vmatmul.mubr.msk.f32.gmra.mrb[18].mxu1 %vm573_vm0, %v6268_v10 }
 0x475   : > { %4916 = vmatprep.mubr.msk.f32.mxu1 %vm573_vm0, %v6270_v11 }
 0x478   : > { %4917 = vmatmul.mubr.msk.f32.gmra.mrb[20].mxu1 %vm573_vm0, %v6272_v12 }
 0x479   : > { %4939 = vmatprep.mubr.msk.f32.mxu1 %vm697_vm3, %v6365_v50 }
 0x47c   : > { %4940 = vmatmul.mubr.msk.f32.vlgmr.msra.gmra.mrb[22].mxu1 %vm697_vm3, %v6373_v51 }
 0x47d   : > { %5190 = vmatpush3.bf16.xpose.msk.msra.mxu1 %vm6171_vm4, %v5185_v49  ;;  %4946 = vmatprep.mubr.msk.f32.mxu1 %vm697_vm3, %v6365_v50 }
 0x47e   : > { %5199 = vmatprep.subr.msk.bf16.mxu1 %vm6171_vm4, %v5185_v49 }
 0x484   : > { %4947 = vmatmul.mubr.msk.f32.vlgmr.msra.gmra.mrb[24].mxu1 %vm697_vm3, %v6373_v51 }
 0x485   : > { %5202 = vmatpush3.bf16.xpose.msk.msra.mxu1 %vm6171_vm4, %v5185_v49  ;;  %4960 = vmatprep.mubr.msk.f32.mxu1 %vm697_vm3, %v6383_v53 }
 0x48c   : > { %4961 = vmatmul.mubr.msk.f32.vlgmr.msra.gmra.mrb[26].mxu1 %vm697_vm3, %v6391_v54 }
 0x52d   : > { %v4850_v57 = vpop.f32.mrb[6].mxu0 }
 0x52e   : > { %v4857_v59 = vpop.f32.mrb[10].mxu1  ;;  %v1349_v61 = vpop.f32.mrb[7].mxu0  ;;  %v1359_v6 = vadd.f32 %v4850_v57, %v1195_v40 }
 0x52f   : > { %v1358_v62 = vadd.f32 %v1349_v61, %v1194_v36  ;;  %v1432_v63 = vpop.f32.mrb[11].mxu1  ;;  %v951_v36 = vmul.f32 %v6139_v5, %v6303_v27  ;;  %v1028_v27 = vmul.f32 %v6139_v5, %v6301_v26 }
 0x530   : > { %v5151_v0 = vpack.c.bf16 %v4857_v59, %v1432_v63 }
 0x531   : > { %4862 = vmatprep.mubr.msk.f32.mxu0 %vm573_vm0, %v1358_v62 }
 0x532   : > { %5152 = vmatprep.subr.bf16.mxu0 %v5151_v0 }
 0x533   : > { %5154 = vmatpush3.bf16.msra.mxu0 %v5151_v0 }
 0x536   : > { %4863 = vmatmul.mubr.msk.f32.vlgmr.msra.gmra.mrb[8].mxu0 %vm573_vm0, %v1359_v6 }
 0x53b   : > { %v4876_v7 = vpop.f32.mrb[12].mxu1 }
 0x53c   : > { %v1695_v8 = vpop.f32.mrb[13].mxu1 }
 0x53d   : > { %v5159_v10 = vpack.c.bf16 %v4876_v7, %v1695_v8 }
 0x53f   : > { %5160 = vmatprep.subr.bf16.mxu0 %v5159_v10  ;;  %v4909_v11 = vpop.f32.mrb[14].mxu1 }
 0x540   : > { %5162 = vmatpush3.bf16.msra.mxu0 %v5159_v10  ;;  %v2154_v12 = vpop.f32.mrb[15].mxu1 }
 0x541   : > { %5164 = vmatprep.subr.bf16.mxu0 %v6318_v38 }
 0x543   : > { %v4912_v16 = vpop.f32.mrb[16].mxu1 }
 0x544   : > { %v2164_v17 = vpop.f32.mrb[17].mxu1 }
 0x547   : > { %v4915_v18 = vpop.f32.mrb[18].mxu1 }
 0x548   : > { %v2174_v20 = vpop.f32.mrb[19].mxu1 }
 0x549   : > { %v5416_v20 = vpop.permute.xlu0 %5415 }
 0x54b   : > { %v4918_v21 = vpop.f32.mrb[20].mxu1 }
 0x54c   : > { %v2184_v22 = vpop.f32.mrb[21].mxu1 }
 0x54f   : > { %v6398_v23 = vpop.f32.mrb[22].mxu1 }
 0x550   : > { %v6400_v1 = vpop.f32.mrb[23].mxu1 }
 0x557   : > { %v4948_v28 = vpop.f32.mrb[24].mxu1 }
 0x558   : > { %v2545_v29 = vpop.f32.mrb[25].mxu1 }
 0x55f   : > { %v6402_v30 = vpop.f32.mrb[26].mxu1 }
 0x560   : > { %v6404_v32 = vpop.f32.mrb[27].mxu1 }
 0x609   : > { %v4864_v33 = vpop.f32.mrb[8].mxu0 }
 0x60a   : > { %v1513_v2 = vpop.f32.mrb[9].mxu0  ;;  %v1523_v34 = vadd.f32 %v4864_v33, %v1359_v6 }
 0x60b   : > { %v1522_v3 = vadd.f32 %v1513_v2, %v1358_v62 }
 0x60d   : > { %4881 = vmatprep.mubr.msk.f32.mxu0 %vm573_vm0, %v1522_v3  ;;  %v2469_v3 = vmul.f32 %v6286_v15, %v6400_v1 }
 0x60e   : > { %4882 = vmatmul.mubr.msk.f32.vlgmr.msra.gmra.mrb[10].mxu0 %vm573_vm0, %v1523_v34  ;;  %v2470_v34 = vmul.f32 %v6398_v23, %v6281_v14 }
 0x60f   : > { %5166 = vmatpush3.bf16.msra.mxu0 %v6318_v38  ;;  %4888 = vmatprep.mubr.msk.f32.mxu0 %vm573_vm0, %v951_v36 }
 0x610   : > { %4891 = vmatprep.subr.msk.mxu0 %vm697_vm3, %v5740_v4 }
 0x612   : > { %4889 = vmatmul.mubr.msk.f32.vlgmr.msra.gmra.mrb[12].mxu0 %vm573_vm0, %v952_v37 }
 0x613   : > { %4893 = vmatprep.mubr.msk.f32.mxu0 %vm697_vm3, %v6209_v56  ;;  %v1029_v56 = vmul.f32 %v6297_v24, %v6146_v9  ;;  %v2555_v24 = vmul.f32 %v4948_v28, %v6281_v14  ;;  %v5418_v28 = vunpack.i.h.bf16 %v5416_v20 }
 0x615   : > { %v2719_v11 = vadd.f32 %v6310_v31, %v2555_v24 }
 0x618   : > { %4892 = vmatpush3.xpose.msk.msra.mxu0 %vm697_vm3, %v5740_v4 }
 0x61b   : > { %4894 = vmatmul.mubr.msk.f32.vlgmr.msra.gmra.mrb[12].mxu0 %vm697_vm3, %v6221_v58 }
 0x61c   : > { %4900 = vmatprep.mubr.msk.f32.mxu0 %vm573_vm0, %v1028_v27 }
 0x6e1   : > { %v4883_v25 = vpop.f32.mrb[10].mxu0 }
 0x6e2   : > { %v1776_v38 = vpop.f32.mrb[11].mxu0 }
 0x6e3   : > { %v5167_v40 = vpack.c.bf16 %v4883_v25, %v1776_v38  ;;  %2193 = vxpose.xlu1.b32.start [1/2] (short) (narrow) %v1776_v38, 64 }
 0x6e5   : > { %5168 = vmatprep.subr.bf16.mxu0 %v5167_v40 }
 0x6e6   : > { %5170 = vmatpush3.bf16.msra.mxu0 %v5167_v40 }
 0x6e7   : > { %2194 = vxpose.xlu1.b32.end [2/2] (short) (narrow) %v4883_v25, 64  ;;  %5176 = vmatprep.subr.bf16.mxu0 %v6194_v52 }
 0x6e9   : > { %4901 = vmatmul.mubr.msk.f32.vlgmr.msra.gmra.mrb[12].mxu0 %vm573_vm0, %v1029_v56 }
 0x6ea   : > { %5178 = vmatpush3.bf16.msra.mxu0 %v6194_v52  ;;  %v2554_v52 = vmul.f32 %v6286_v15, %v2545_v29  ;;  %v5417_v29 = vunpack.i.l.bf16 %v5416_v20 }
 0x6eb   : > { %5193 = vmatprep.subr.msk.bf16.mxu0 %vm6171_vm4, %v6338_v46 }
 0x6ec   : > { %v5203_v42 = vpack.c.bf16 %v2555_v24, %v2554_v52  ;;  %v2718_v44 = vadd.f32 %v6291_v19, %v2554_v52  ;;  %v6480_v2 = vpack.c.bf16 %v5418_v28, %v5417_v29 }
 0x71d   : > { %3216 = vrot.lane.b32.xlu1 %v6242_v60, %s5741_s9 }
 0x721   : > { %5430 = vrot.lane.b32.xlu1 %v5740_v4, %s5741_s9 }
 0x725   : > { %5440 = vrot.lane.b32.xlu1 %v5439_v55, %s5741_s9 }
 0x763   : > { %v2209_v58 = vpop.trf.xlu1 }
 0x764   : > { %4923 = vmatprep.mubr.msk.f32.mxu0 %vm573_vm0, %v2209_v58 }
 0x767   : > { %v2210_v26 = vpop.trf.xlu1 }
 0x768   : > { %4924 = vmatmul.mubr.msk.f32.vlgmr.msra.gmra.mrb[14].mxu0 %vm573_vm0, %v2210_v26 }
 0x769   : > { %5196 = vmatpush3.bf16.xpose.msk.msra.mxu0 %vm6171_vm4, %v6338_v46 }
 0x76a   : > { %5204 = vmatprep.subr.bf16.mxu0 %v5203_v42 }
 0x76b   : > { %v2211_v4 = vpop.trf.xlu1 }
 0x76c   : > { %4926 = vmatprep.mubr.msk.f32.mxu0 %vm573_vm0, %v2211_v4 }
 0x76f   : > { %v2212_v39 = vpop.trf.xlu1 }
 0x770   : > { %4927 = vmatmul.mubr.msk.f32.gmra.mrb[16].mxu0 %vm573_vm0, %v2212_v39 }
 0x773   : > { %v2213_v48 = vpop.trf.xlu1 }
 0x774   : > { %4929 = vmatprep.mubr.msk.f32.mxu0 %vm573_vm0, %v2213_v48 }
 0x777   : > { %v2214_v55 = vpop.trf.xlu1 }
 0x778   : > { %4930 = vmatmul.mubr.msk.f32.gmra.mrb[18].mxu0 %vm573_vm0, %v2214_v55 }
 0x77b   : > { %v2215_v60 = vpop.trf.xlu1 }
 0x77c   : > { %4932 = vmatprep.mubr.msk.f32.mxu0 %vm573_vm0, %v2215_v60 }
 0x77f   : > { %v2216_v43 = vpop.trf.xlu1 }
 0x780   : > { %4933 = vmatmul.mubr.msk.f32.gmra.mrb[20].mxu0 %vm573_vm0, %v2216_v43 }
 0x781   : > { %4953 = vmatprep.mubr.msk.f32.mxu0 %vm697_vm3, %v6383_v53 }
 0x784   : > { %4954 = vmatmul.mubr.msk.f32.vlgmr.msra.gmra.mrb[22].mxu0 %vm697_vm3, %v6391_v54 }
 0x785   : > { %5206 = vmatpush3.bf16.msra.mxu0 %v5203_v42  ;;  %4967 = vmatprep.mubr.msk.f32.mxu0 %vm573_vm0, %v2554_v52 }
 0x788   : > { %4968 = vmatmul.mubr.msk.f32.vlgmr.msra.gmra.mrb[24].mxu0 %vm573_vm0, %v2555_v24 }
 0x789   : > { %4974 = vmatprep.mubr.msk.f32.mxu0 %vm573_vm0, %v2718_v44 }
 0x78f   : > { %v3217_v45 = vpop.permute.xlu1 %3216 }
 0x790   : > { %3729 = vxpose.xlu0.b32.end [2/2] (short) (narrow) %v3217_v45, 64  ;;  %v6477_v33 = vpack.c.bf16 %v3217_v45, %v6278_v13  ;;  %v5421_v13 = vpop.permute.xlu0 %5420 }
 0x791   : > { %v5423_v36 = vunpack.i.h.bf16 %v5421_v13  ;;  %v5422_v37 = vunpack.i.l.bf16 %v5421_v13 }
 0x793   : > { %v5237_v15 = vpack.c.bf16 %v5423_v36, %v5422_v37  ;;  %v5431_v23 = vpop.permute.xlu1 %5430 }
 0x794   : > { %v5426_v1 = vpop.permute.xlu0 %5425  ;;  %v5433_v38 = vunpack.i.h.bf16 %v5431_v23  ;;  %v5432_v40 = vunpack.i.l.bf16 %v5431_v23 }
 0x795   : > { %v5428_v27 = vunpack.i.h.bf16 %v5426_v1  ;;  %v5427_v25 = vunpack.i.l.bf16 %v5426_v1 }
 0x797   : > { %v5243_v14 = vpack.c.bf16 %v5428_v27, %v5427_v25 }
 0x798   : > { %v5436_v56 = vpop.permute.xlu0 %5435 }
 0x799   : > { %v5438_v58 = vunpack.i.h.bf16 %v5436_v56  ;;  %v5437_v24 = vunpack.i.l.bf16 %v5436_v56 }
 0x79b   : > { %v5291_v52 = vpack.c.bf16 %v5438_v58, %v5437_v24 }
 0x7bc   : > { %v6463_v46 = vpop.f32.mrb[12].mxu0 }
 0x7bd   : > { %v6465_v35 = vpop.f32.mrb[13].mxu0 }
 0x83b   : > { %v4925_v47 = vpop.f32.mrb[14].mxu0 }
 0x83c   : > { %v2315_v49 = vpop.f32.mrb[15].mxu0 }
 0x843   : > { %v4928_v57 = vpop.f32.mrb[16].mxu0 }
 0x844   : > { %v2325_v59 = vpop.f32.mrb[17].mxu0 }
 0x84b   : > { %v4931_v61 = vpop.f32.mrb[18].mxu0 }
 0x84c   : > { %v2335_v62 = vpop.f32.mrb[19].mxu0 }
 0x84d   : > { %v3744_v62 = vpop.trf.xlu0 }
 0x851   : > { %v3745_v41 = vpop.trf.xlu0 }
 0x853   : > { %v4934_v63 = vpop.f32.mrb[20].mxu0 }
 0x854   : > { %v2345_v0 = vpop.f32.mrb[21].mxu0  ;;  %v5441_v63 = vpop.permute.xlu1 %5440 }
 0x855   : > { %v5443_v0 = vunpack.i.h.bf16 %v5441_v63 }
 0x857   : > { %v6467_v6 = vpop.f32.mrb[22].mxu0 }
 0x858   : > { %v6469_v19 = vpop.f32.mrb[23].mxu0  ;;  %v2640_v61 = vmul.f32 %v6467_v6, %v6146_v9  ;;  %v5442_v6 = vunpack.i.l.bf16 %v5441_v63 }
 0x859   : > { %v2639_v59 = vmul.f32 %v6139_v5, %v6469_v19 }
 0x85b   : > { %v4969_v7 = vpop.f32.mrb[24].mxu0 }
 0x85c   : > { %v2792_v8 = vpop.f32.mrb[25].mxu0 }
 0x85d   : > { %v5207_v10 = vpack.c.bf16 %v4969_v7, %v2792_v8  ;;  %4981 = vmatprep.mubr.msk.f32.mxu1 %vm573_vm0, %v2792_v8 }
 0x85f   : > { %5208 = vmatprep.subr.bf16.mxu0 %v5207_v10  ;;  %5212 = vmatprep.subr.bf16.mxu1 %v5207_v10 }
 0x860   : > { %5210 = vmatpush3.bf16.msra.mxu0 %v5207_v10  ;;  %5214 = vmatpush3.bf16.msra.mxu1 %v5207_v10  ;;  %v5295_v10 = vpack.c.bf16 %v5443_v0, %v5442_v6 }
 0x863   : > { %4975 = vmatmul.mubr.msk.f32.vlgmr.msra.gmra.mrb[26].mxu0 %vm573_vm0, %v2719_v11  ;;  %4982 = vmatmul.mubr.msk.f32.vlgmr.msra.gmra.mrb[28].mxu1 %vm573_vm0, %v4969_v7 }
 0x936   : > { %v4976_v12 = vpop.f32.mrb[26].mxu0  ;;  %v4983_v16 = vpop.f32.mrb[28].mxu1 }
 0x937   : > { %v2873_v17 = vpop.f32.mrb[27].mxu0  ;;  %v2956_v18 = vpop.f32.mrb[29].mxu1  ;;  %v2883_v31 = vadd.f32 %v4976_v12, %v2719_v11 }
 0x938   : > { %v2882_v21 = vadd.f32 %v2873_v17, %v2718_v44  ;;  %v5215_v22 = vpack.c.bf16 %v4983_v16, %v2956_v18  ;;  %4995 = vmatprep.mubr.msk.f32.mxu1 %vm573_vm0, %v2956_v18 }
 0x93a   : > { %5216 = vmatprep.subr.bf16.mxu0 %v5215_v22  ;;  %4988 = vmatprep.mubr.msk.f32.mxu0 %vm573_vm0, %v2882_v21 }
 0x93b   : > { %5220 = vmatprep.subr.bf16.mxu1 %v5215_v22  ;;  %5218 = vmatpush3.bf16.msra.mxu0 %v5215_v22 }
 0x93c   : > { %5222 = vmatpush3.bf16.msra.mxu1 %v5215_v22 }
 0x93d   : > { %5228 = vmatprep.subr.bf16.mxu1 %v6477_v33 }
 0x93e   : > { %4989 = vmatmul.mubr.msk.f32.vlgmr.msra.gmra.mrb[28].mxu0 %vm573_vm0, %v2883_v31 }
 0x93f   : > { %4996 = vmatmul.mubr.msk.f32.vlgmr.msra.gmra.mrb[30].mxu1 %vm573_vm0, %v4983_v16 }
 0x940   : > { %5230 = vmatpush3.bf16.msra.mxu1 %v6477_v33  ;;  %5009 = vmatprep.mubr.msk.f32.mxu1 %vm573_vm0, %v2469_v3 }
 0x941   : > { %5233 = vmatprep.subr.msk.bf16.mxu1 %vm6171_vm4, %v6480_v2 }
 0x943   : > { %5010 = vmatmul.mubr.msk.f32.vlgmr.msra.gmra.mrb[32].mxu1 %vm573_vm0, %v2470_v34 }
 0x944   : > { %5028 = vmatprep.mubr.msk.f32.mxu1 %vm697_vm3, %v6365_v50  ;;  %v5249_v50 = vpack.c.bf16 %v5433_v38, %v5432_v40 }
 0x949   : > { %5236 = vmatpush3.bf16.xpose.msk.msra.mxu1 %vm6171_vm4, %v6480_v2 }
 0x94a   : > { %5239 = vmatprep.subr.msk.bf16.mxu1 %vm6171_vm4, %v5237_v15 }
 0x951   : > { %5242 = vmatpush3.bf16.xpose.msk.msra.mxu1 %vm6171_vm4, %v5237_v15 }
 0x952   : > { %5245 = vmatprep.subr.msk.bf16.mxu1 %vm6171_vm4, %v5243_v14 }
 0x959   : > { %5248 = vmatpush3.bf16.xpose.msk.msra.mxu1 %vm6171_vm4, %v5243_v14 }
 0x95a   : > { %5251 = vmatprep.subr.msk.bf16.mxu1 %vm6171_vm4, %v5249_v50 }
 0x961   : > { %5254 = vmatpush3.bf16.xpose.msk.msra.mxu1 %vm6171_vm4, %v5249_v50 }
 0x962   : > { %5292 = vmatprep.subr.bf16.mxu1 %v5291_v52 }
 0x968   : > { %5029 = vmatmul.mubr.msk.f32.vlgmr.msra.gmra.mrb[32].mxu1 %vm697_vm3, %v6373_v51 }
 0x969   : > { %5294 = vmatpush3.bf16.msra.mxu1 %v5291_v52  ;;  %5075 = vmatprep.mubr.msk.f32.mxu1 %vm573_vm0, %v3744_v62 }
 0x96c   : > { %5076 = vmatmul.mubr.msk.f32.vlgmr.msra.gmra.mrb[34].mxu1 %vm573_vm0, %v3745_v41 }
 0xa11   : > { %v4990_v26 = vpop.f32.mrb[28].mxu0 }
 0xa12   : > { %v4997_v42 = vpop.f32.mrb[30].mxu1  ;;  %v3037_v4 = vpop.f32.mrb[29].mxu0  ;;  %v3047_v60 = vadd.f32 %v4990_v26, %v2883_v31 }
 0xa13   : > { %v3046_v39 = vadd.f32 %v3037_v4, %v2882_v21  ;;  %v3120_v48 = vpop.f32.mrb[31].mxu1 }
 0xa14   : > { %v5223_v55 = vpack.c.bf16 %v4997_v42, %v3120_v48 }
 0xa15   : > { %5002 = vmatprep.mubr.msk.f32.mxu0 %vm573_vm0, %v3046_v39 }
 0xa16   : > { %5224 = vmatprep.subr.bf16.mxu0 %v5223_v55 }
 0xa17   : > { %5226 = vmatpush3.bf16.msra.mxu0 %v5223_v55 }
 0xa1a   : > { %5003 = vmatmul.mubr.msk.f32.vlgmr.msra.gmra.mrb[30].mxu0 %vm573_vm0, %v3047_v60 }
 0xa3b   : > { %v5030_v43 = vpop.f32.mrb[32].mxu1 }
 0xa3c   : > { %v3399_v44 = vpop.f32.mrb[33].mxu1 }
 0xa3d   : > { %v5255_v45 = vpack.c.bf16 %v5030_v43, %v3399_v44 }
 0xa3f   : > { %5256 = vmatprep.subr.bf16.mxu0 %v5255_v45 }
 0xa40   : > { %5258 = vmatpush3.bf16.msra.mxu0 %v5255_v45 }
 0xa41   : > { %5260 = vmatprep.subr.bf16.mxu0 %v6477_v33 }
 0xaed   : > { %v5004_v51 = vpop.f32.mrb[30].mxu0 }
 0xaee   : > { %v3201_v47 = vpop.f32.mrb[31].mxu0  ;;  %v3211_v57 = vadd.f32 %v5004_v51, %v3047_v60 }
 0xaef   : > { %v3210_v49 = vadd.f32 %v3201_v47, %v3046_v39 }
 0xaf1   : > { %5035 = vmatprep.mubr.msk.f32.mxu0 %vm573_vm0, %v3210_v49 }
 0xaf2   : > { %5036 = vmatmul.mubr.msk.f32.vlgmr.msra.gmra.mrb[32].mxu0 %vm573_vm0, %v3211_v57 }
 0xaf3   : > { %5262 = vmatpush3.bf16.msra.mxu0 %v6477_v33  ;;  %5042 = vmatprep.mubr.msk.f32.mxu0 %vm573_vm0, %v2639_v59  ;;  %v5077_v33 = vpop.f32.mrb[34].mxu1 }
 0xaf4   : > { %5265 = vmatprep.subr.msk.bf16.mxu0 %vm6171_vm4, %v6480_v2  ;;  %v3858_v31 = vpop.f32.mrb[35].mxu1 }
 0xaf6   : > { %5043 = vmatmul.mubr.msk.f32.vlgmr.msra.gmra.mrb[34].mxu0 %vm573_vm0, %v2640_v61 }
 0xaf7   : > { %5061 = vmatprep.mubr.msk.f32.mxu0 %vm697_vm3, %v6383_v53  ;;  %v2716_v53 = vmul.f32 %v6139_v5, %v6404_v32  ;;  %v2717_v5 = vmul.f32 %v6402_v30, %v6146_v9 }
 0xafc   : > { %5268 = vmatpush3.bf16.xpose.msk.msra.mxu0 %vm6171_vm4, %v6480_v2 }
 0xafd   : > { %5271 = vmatprep.subr.msk.bf16.mxu0 %vm6171_vm4, %v5237_v15 }
 0xb04   : > { %5274 = vmatpush3.bf16.xpose.msk.msra.mxu0 %vm6171_vm4, %v5237_v15 }
 0xb05   : > { %5277 = vmatprep.subr.msk.bf16.mxu0 %vm6171_vm4, %v5243_v14 }
 0xb0c   : > { %5280 = vmatpush3.bf16.xpose.msk.msra.mxu0 %vm6171_vm4, %v5243_v14 }
 0xb0d   : > { %5283 = vmatprep.subr.msk.bf16.mxu0 %vm6171_vm4, %v5249_v50 }
 0xb14   : > { %5286 = vmatpush3.bf16.xpose.msk.msra.mxu0 %vm6171_vm4, %v5249_v50 }
 0xb1b   : > { %5062 = vmatmul.mubr.msk.f32.vlgmr.msra.gmra.mrb[34].mxu0 %vm697_vm3, %v6391_v54  ;;  %v3746_v54 = vpop.trf.xlu0 }
 0xb1c   : > { %5068 = vmatprep.mubr.msk.f32.mxu0 %vm573_vm0, %v2716_v53  ;;  %5078 = vmatprep.mubr.msk.f32.mxu1 %vm573_vm0, %v3746_v54 }
 0xb1f   : > { %v3747_v32 = vpop.trf.xlu0 }
 0xb20   : > { %5079 = vmatmul.mubr.msk.f32.gmra.mrb[36].mxu1 %vm573_vm0, %v3747_v32 }
 0xb23   : > { %v3748_v11 = vpop.trf.xlu0 }
 0xb24   : > { %5081 = vmatprep.mubr.msk.f32.mxu1 %vm573_vm0, %v3748_v11 }
 0xb27   : > { %v3749_v12 = vpop.trf.xlu0 }
 0xb28   : > { %5082 = vmatmul.mubr.msk.f32.gmra.mrb[38].mxu1 %vm573_vm0, %v3749_v12 }
 0xb2b   : > { %v3750_v16 = vpop.trf.xlu0 }
 0xb2c   : > { %5084 = vmatprep.mubr.msk.f32.mxu1 %vm573_vm0, %v3750_v16 }
 0xb2f   : > { %v3751_v9 = vpop.trf.xlu0 }
 0xb30   : > { %5085 = vmatmul.mubr.msk.f32.gmra.mrb[40].mxu1 %vm573_vm0, %v3751_v9 }
 0xbc5   : > { %v5037_v19 = vpop.f32.mrb[32].mxu0 }
 0xbc6   : > { %v3480_v7 = vpop.f32.mrb[33].mxu0 }
 0xbc7   : > { %v5287_v8 = vpack.c.bf16 %v5037_v19, %v3480_v7  ;;  %3897 = vxpose.xlu1.b32.start [1/2] (short) (narrow) %v3480_v7, 64 }
 0xbc9   : > { %5288 = vmatprep.subr.bf16.mxu0 %v5287_v8 }
 0xbca   : > { %5290 = vmatpush3.bf16.msra.mxu0 %v5287_v8 }
 0xbcb   : > { %3898 = vxpose.xlu1.b32.end [2/2] (short) (narrow) %v5037_v19, 64  ;;  %5296 = vmatprep.subr.bf16.mxu0 %v5295_v10 }
 0xbcd   : > { %5069 = vmatmul.mubr.msk.f32.vlgmr.msra.gmra.mrb[34].mxu0 %vm573_vm0, %v2717_v5 }
 0xbce   : > { %5298 = vmatpush3.bf16.msra.mxu0 %v5295_v10 }
 0xbf3   : > { %v5080_v13 = vpop.f32.mrb[36].mxu1 }
 0xbf4   : > { %v3868_v34 = vpop.f32.mrb[37].mxu1 }
 0xbfb   : > { %v5083_v36 = vpop.f32.mrb[38].mxu1 }
 0xbfc   : > { %v3878_v37 = vpop.f32.mrb[39].mxu1 }
 0xc03   : > { %v5086_v15 = vpop.f32.mrb[40].mxu1 }
 0xc04   : > { %v3888_v1 = vpop.f32.mrb[41].mxu1 }
 0xc47   : > { %v3913_v30 = vpop.trf.xlu1 }
 0xc48   : > { %5091 = vmatprep.mubr.msk.f32.mxu0 %vm573_vm0, %v3913_v30 }
 0xc4b   : > { %v3914_v17 = vpop.trf.xlu1 }
 0xc4c   : > { %5092 = vmatmul.mubr.msk.f32.vlgmr.msra.gmra.mrb[36].mxu0 %vm573_vm0, %v3914_v17 }
 0xc4f   : > { %v3915_v18 = vpop.trf.xlu1 }
 0xc50   : > { %5094 = vmatprep.mubr.msk.f32.mxu0 %vm573_vm0, %v3915_v18 }
 0xc53   : > { %v3916_v20 = vpop.trf.xlu1 }
 0xc54   : > { %5095 = vmatmul.mubr.msk.f32.gmra.mrb[38].mxu0 %vm573_vm0, %v3916_v20 }
 0xc57   : > { %v3917_v21 = vpop.trf.xlu1 }
 0xc58   : > { %5097 = vmatprep.mubr.msk.f32.mxu0 %vm573_vm0, %v3917_v21 }
 0xc5b   : > { %v3918_v22 = vpop.trf.xlu1 }
 0xc5c   : > { %5098 = vmatmul.mubr.msk.f32.gmra.mrb[40].mxu0 %vm573_vm0, %v3918_v22 }
 0xc5f   : > { %v3919_v28 = vpop.trf.xlu1 }
 0xc60   : > { %5100 = vmatprep.mubr.msk.f32.mxu0 %vm573_vm0, %v3919_v28 }
 0xc63   : > { %v3920_v29 = vpop.trf.xlu1 }
 0xc64   : > { %5101 = vmatmul.mubr.msk.f32.gmra.mrb[42].mxu0 %vm573_vm0, %v3920_v29 }
 0xca0   : > { %v5070_v2 = vpop.f32.mrb[34].mxu0 }
 0xca1   : > { %4150 = vrot.lane.b32.xlu1 %v5070_v2, %s5741_s9  ;;  %v3717_v3 = vpop.f32.mrb[35].mxu0 }
 0xca2   : > { %4148 = vrot.lane.b32.xlu0 %v3717_v3, %s5741_s9 }
 0xd13   : > { %v4151_v27 = vpop.permute.xlu1 %4150 }
 0xd14   : > { %v4155_v25 = vsel %vm697_vm3, %v6463_v46, %v4151_v27  ;;  %v4149_v14 = vpop.permute.xlu0 %4148 }
 0xd15   : > { %4157 = vst [vmem:[%s528_s23 + $0x8] sm:$0xff] %v4155_v25  ;;  %v4154_v23 = vsel %vm697_vm3, %v6465_v35, %v4149_v14 }
 0xd16   : > { %4156 = vst [vmem:[%s528_s23] sm:$0xff] %v4154_v23 }
 0xd17   : > { %5649 = shalt.err (!%p5646_p11)
}
 0xd18   : > { %s5650_s20 = scalar_lea.hbm %s6579_s26, 256  ;;  %s5654_s12 = scalar_lea.hbm %s6638_s6, 512 }
 0xd19   : > { %p5651_p6 = scmp.ne.s32.totalorder %s6579_s26, %s5650_s20  ;;  %p5655_p3 = scmp.lt.u32.totalorder %s6579_s26, %s6638_s6 }
 0xd1a   : > { %p5656_p4 = scmp.lt.u32.totalorder %s5654_s12, %s5650_s20  ;;  %p5658_p0 = scmp.lt.u32.totalorder %s5650_s20, %s6579_s26 }
 0xd1b   : > { %p5652_p2 = pnand %p5651_p6, %p6678_p10 }
 0xd1c   : > { %p5657_p5 = por %p5656_p4, %p5655_p3 }
 0xd1d   : > { %p5653_p7 = pneg %p5652_p2 }
 0xd1e   : > { %p5659_p9 = por %p5658_p0, %p5657_p5 }
 0xd20   : > { %p5660_p12 = pnand %p5659_p9, %p5653_p7 }
 0xd22   : > { %5663 = shalt.err (!%p5660_p12)
}
 0xd23   : > { %s5743_s25 = smov 128   ;;  %s5744_s27 = smov 8   ;;  %v5093_v46 = vpop.f32.mrb[36].mxu0 }
 0xd24   : > { %5323 = dma.vmem_to_hbm [thread:$0]  (%p6678_p10), %s6574_s8, 256, %s6579_s26, %s4175_s24, %s5743_s25, %s5743_s25, %s5744_s27   ;;  %v4027_v35 = vpop.f32.mrb[37].mxu0 }
 0xd27   : > { %v5096_v38 = vpop.f32.mrb[38].mxu0 }
 0xd28   : > { %v4037_v40 = vpop.f32.mrb[39].mxu0 }
 0xd2f   : > { %v5099_v50 = vpop.f32.mrb[40].mxu0 }
 0xd30   : > { %v4047_v56 = vpop.f32.mrb[41].mxu0 }
 0xd37   : > { %v5102_v58 = vpop.f32.mrb[42].mxu0 }
 0xd38   : > { %v4057_v24 = vpop.f32.mrb[43].mxu0 }
 0xd39 PF: > { %s6679_s28 = sld [smem:[#allocation25_spill]]  ;;  %s6680_s30 = sld [smem:[#allocation22_spill]] }
 0xd3a   : > { %s4206_s9 = sand.u32 1, %s5710_s21  }
 0xd3b   : > { %s4207_s23 = scalar_lea.sflag [#allocation5], %s4206_s9 }
 0xd3f   : > { %p6681_p8 = scmp.ne.s32.totalorder %s6679_s28, 0  ;;  %p6682_p1 = scmp.ge.s32.totalorder %s6680_s30, 2 }
 0xd41   : > { %p5345_p13 = pnand %p6682_p1, %p6681_p8 }
 0xd43   : > { %5705 = dma.done.wait (!%p5345_p13), %s4207_s23, 256  }
 0xd44   : > { %5707 = vsyncadd (!%p5345_p13), %s4207_s23, 4294967040  ;;  %s31_s26 = sadd.s32 1, %s6680_s30   ;;  %s6683_s10 = sld [smem:[#allocation20_spill]] }
 0xd45   : > { %p28_p10 = scmp.ge.s32.totalorder %s31_s26, 4   ;;  %s6684_s23 = sld [smem:[#allocation24_spill]] }
 0xd46   : > { %s6685_s24 = sld [smem:[#allocation21_spill]]  ;;  %s6686_s25 = sld [smem:[#allocation23_spill]] }
 0xd47   : > { %s6687_s21 = smov %s5714_s22  ;;  %30 = sbr.rel (!%p28_p10) target bundleno = 15 (0xf), region = 154 }
 0xd4a   : > { %s6688_s22 = smov %s6683_s10 }
 0xd4e   :  { %4212 = vsyncpa [#allocation4], 1 }
 0xd4f   :  { %4214 = vsyncpa [#allocation4 + $0x1], 1 }
 0xd50   :  { %4215 = vsyncpa [#allocation7], 1 }
 0xd51   :  { %4217 = vsyncpa [#allocation7 + $0x1], 1 }
 0xd52   :  { %4218 = vsyncpa [#allocation10], 1 }
 0xd53   :  { %4220 = vsyncpa [#allocation10 + $0x1], 1 }
 0xd54   :  { %4221 = vsyncpa [#allocation13], 1 }
 0xd55   :  { %4223 = vsyncpa [#allocation13 + $0x1], 1 }
 0xd56   :  { %4224 = vsyncpa [#allocation5], 1 }
 0xd57   :  { %4226 = vsyncpa [#allocation5 + $0x1], 1 }

</bundles_post_ra>
